<compile_context>
chip_gen: v7x
topology: tpu7x:2x2x1
jax: 0.10.0
libtpu: 0.0.40
codegen_flags: <defaults>
</compile_context>

<pallas_src>
import numpy as np

import jax
import jax.numpy as jnp
from jax.experimental import pallas as pl
from jax.experimental.pallas import tpu as pltpu


# ------------------------------- Pallas kernel -------------------------------

def _smooth_sums_kernel(x_ref, sdx2_ref, sdxdy_ref, sdydx_ref, sdy2_ref):
    """Accumulate the four |second-difference| sums over a block of P planes.

    Grid = (splits, steps): axis 0 is "parallel" (v7x megacore split; each
    split owns its own output row), axis 1 is the "arbitrary" reduction over
    blocks of planes.  All four sums come from one HBM read of the block.
    """
    @pl.when(pl.program_id(1) == 0)
    def _init():
        sdx2_ref[...] = jnp.zeros_like(sdx2_ref)
        sdxdy_ref[...] = jnp.zeros_like(sdxdy_ref)
        sdydx_ref[...] = jnp.zeros_like(sdydx_ref)
        sdy2_ref[...] = jnp.zeros_like(sdy2_ref)

    x = x_ref[...].astype(jnp.float32)          # (P, H, W)

    # First differences (identical to the PyTorch gradient()).
    dx = x[:, :, 1:] - x[:, :, :-1]             # (P, H,   W-1)  width diff
    dy = x[:, 1:, :] - x[:, :-1, :]             # (P, H-1, W  )  height diff

    # Second differences.
    dx2 = dx[:, :, 1:] - dx[:, :, :-1]          # (P, H,   W-2)
    dxdy = dx[:, 1:, :] - dx[:, :-1, :]         # (P, H-1, W-1)
    dydx = dy[:, :, 1:] - dy[:, :, :-1]         # (P, H-1, W-1)
    dy2 = dy[:, 1:, :] - dy[:, :-1, :]          # (P, H-2, W  )

    sdx2_ref[...] += jnp.sum(jnp.abs(dx2))
    sdxdy_ref[...] += jnp.sum(jnp.abs(dxdy))
    sdydx_ref[...] += jnp.sum(jnp.abs(dydx))
    sdy2_ref[...] += jnp.sum(jnp.abs(dy2))


# ----------------------------- pallas_call wrapper -----------------------------

_BLOCK_BYTES = 512 * 1024   # per-step input block budget (Pallas double-buffers it)


def _abs_grad2_sums(planes, splits, steps, p):
    n_pad, h, w = planes.shape
    assert n_pad == splits * steps * p
    out_sd = jax.ShapeDtypeStruct((splits, 1, 1), jnp.float32)
    out_spec = pl.BlockSpec((None, 1, 1), lambda c, i: (c, 0, 0))
    return pl.pallas_call(
        _smooth_sums_kernel,
        out_shape=(out_sd,) * 4,
        grid_spec=pltpu.PrefetchScalarGridSpec(
            num_scalar_prefetch=0,
            grid=(splits, steps),
            in_specs=[pl.BlockSpec((p, h, w),
                                   lambda c, i: (c * steps + i, 0, 0))],
            out_specs=(out_spec,) * 4),
        compiler_params=pltpu.CompilerParams(
            dimension_semantics=("parallel", "arbitrary")),
    )(planes)


def _single_map_loss(x):
    assert x.ndim == 4, "SmoothLoss expects NCHW input"
    b, c, h, w = x.shape
    assert h >= 3 and w >= 3, "spatial dims must be >= 3 for second differences"
    n = b * c
    planes = x.reshape(n, h, w)

    # Planes per grid step: biggest block under the VMEM budget.
    plane_bytes = h * w * planes.dtype.itemsize
    p = int(max(1, min(n, _BLOCK_BYTES // max(plane_bytes, 1))))
    steps_total = -(-n // p)                       # ceil
    splits = 2 if steps_total >= 2 else 1          # v7x 2-TC split; no-op on v5e/v6e
    steps = -(-steps_total // splits)
    n_pad = splits * steps * p
    if n_pad != n:
        # Zero planes contribute 0 to every |difference| sum.
        planes = jnp.pad(planes, ((0, n_pad - n), (0, 0), (0, 0)))

    s_dx2, s_dxdy, s_dydx, s_dy2 = _abs_grad2_sums(planes, splits, steps, p)
    s_dx2 = jnp.sum(s_dx2)
    s_dxdy = jnp.sum(s_dxdy)
    s_dydx = jnp.sum(s_dydx)
    s_dy2 = jnp.sum(s_dy2)

    # Means use the true (unpadded) element counts.
    return (s_dx2 / jnp.float32(n * h * (w - 2))
            + s_dxdy / jnp.float32(n * (h - 1) * (w - 1))
            + s_dydx / jnp.float32(n * (h - 1) * (w - 1))
            + s_dy2 / jnp.float32(n * (h - 2) * w))


def smooth_loss(pred_map):
    """Pallas TPU forward of SmoothLoss (single tensor or list of tensors)."""
    if not isinstance(pred_map, (tuple, list)):
        pred_map = [pred_map]
    loss = jnp.float32(0.0)
    weight = 1.0
    for m in pred_map:
        loss = loss + jnp.float32(weight) * _single_map_loss(m)
        weight /= 2.3
    return loss


# ----------------------------- pure-JAX reference -----------------------------

def _reference_smooth_loss(pred_map):
    if not isinstance(pred_map, (tuple, list)):
        pred_map = [pred_map]

    def gradient(pred):
        d_dy = pred[:, :, 1:] - pred[:, :, :-1]
        d_dx = pred[:, :, :, 1:] - pred[:, :, :, :-1]
        return d_dx, d_dy

    loss = jnp.float32(0.0)
    weight = 1.0
    for m in pred_map:
        m = m.astype(jnp.float32)
        dx, dy = gradient(m)
        dx2, dxdy = gradient(dx)
        dydx, dy2 = gradient(dy)
        loss = loss + (jnp.mean(jnp.abs(dx2)) + jnp.mean(jnp.abs(dxdy))
                       + jnp.mean(jnp.abs(dydx)) + jnp.mean(jnp.abs(dy2))) * weight
        weight /= 2.3
    return loss


if __name__ == "__main__":
    key = jax.random.PRNGKey(0)
    k1, k2, k3 = jax.random.split(key, 3)

    # Case 1: single full-resolution map (B, C, H, W).
    m1 = jax.random.normal(k1, (2, 4, 32, 128), dtype=jnp.float32)
    # Case 2: multi-scale list (exercises the 1/2.3 weighting path).
    m2 = jax.random.normal(k2, (2, 4, 16, 64), dtype=jnp.float32)
    # Case 3: many planes -> multi-step reduction grid, 2-way parallel split,
    # and zero-padding of the plane axis.
    m3 = jax.random.normal(k3, (1, 80, 32, 128), dtype=jnp.float32)

    cases = (("single", m1), ("multiscale", [m1, m2]), ("many_planes", m3))
    for name, inp in cases:
        out = jax.block_until_ready(smooth_loss(inp))
        ref = jax.block_until_ready(_reference_smooth_loss(inp))
        np.testing.assert_allclose(np.asarray(out), np.asarray(ref),
                                   rtol=1e-4, atol=1e-5)
        assert np.isfinite(np.asarray(out)), name

    print("KERNEL_OK")
</pallas_src>

<mosaic_0001>
module attributes {stable_mosaic.version = 11 : i64} {
  func.func @_smooth_sums_kernel(%arg0: i32, %arg1: i32, %arg2: memref<8x32x128xf32, #tpu.memory_space<vmem>>, %arg3: memref<1x1x1xf32, #tpu.memory_space<vmem>>, %arg4: memref<1x1x1xf32, #tpu.memory_space<vmem>>, %arg5: memref<1x1x1xf32, #tpu.memory_space<vmem>>, %arg6: memref<1x1x1xf32, #tpu.memory_space<vmem>>) attributes {dimension_semantics = [#tpu.dimension_semantics<parallel>, #tpu.dimension_semantics<arbitrary>], iteration_bounds = array<i64: 1, 1>, scalar_prefetch = 0 : i64, scratch_operands = 0 : i64, tpu.core_type = #tpu.core_type<tc>, window_params = [{transform_indices = @transform_0, window_bounds = array<i64: 8, 32, 128>}, {transform_indices = @transform_1, window_bounds = array<i64: 1, 1, 1>}, {transform_indices = @transform_2, window_bounds = array<i64: 1, 1, 1>}, {transform_indices = @transform_3, window_bounds = array<i64: 1, 1, 1>}, {transform_indices = @transform_4, window_bounds = array<i64: 1, 1, 1>}]} {
    %c0_i32 = arith.constant 0 : i32
    %0 = arith.cmpi eq, %arg1, %c0_i32 : i32
    %1 = arith.extui %0 : i1 to i32
    %c0_i32_0 = arith.constant 0 : i32
    %2 = arith.cmpi ne, %1, %c0_i32_0 : i32
    scf.if %2 {
      %cst_30 = arith.constant 0.000000e+00 : f32
      %70 = vector.broadcast %cst_30 : f32 to vector<1x1xf32>
      %c0_31 = arith.constant 0 : index
      %c0_32 = arith.constant 0 : index
      %c0_33 = arith.constant 0 : index
      %71 = vector.load %arg3[%c0_31, %c0_32, %c0_33] : memref<1x1x1xf32, #tpu.memory_space<vmem>>, vector<1x1x1xf32>
      %72 = vector.shape_cast %71 : vector<1x1x1xf32> to vector<1x1xf32>
      %73 = vector.shape_cast %70 : vector<1x1xf32> to vector<1x1x1xf32>
      tpu.vector_store %arg3[%c0_31, %c0_32, %c0_33], %73 {strides = array<i32>} : memref<1x1x1xf32, #tpu.memory_space<vmem>>, vector<1x1x1xf32>,
      %cst_34 = arith.constant 0.000000e+00 : f32
      %74 = vector.broadcast %cst_34 : f32 to vector<1x1xf32>
      %c0_35 = arith.constant 0 : index
      %c0_36 = arith.constant 0 : index
      %c0_37 = arith.constant 0 : index
      %75 = vector.load %arg4[%c0_35, %c0_36, %c0_37] : memref<1x1x1xf32, #tpu.memory_space<vmem>>, vector<1x1x1xf32>
      %76 = vector.shape_cast %75 : vector<1x1x1xf32> to vector<1x1xf32>
      %77 = vector.shape_cast %74 : vector<1x1xf32> to vector<1x1x1xf32>
      tpu.vector_store %arg4[%c0_35, %c0_36, %c0_37], %77 {strides = array<i32>} : memref<1x1x1xf32, #tpu.memory_space<vmem>>, vector<1x1x1xf32>,
      %cst_38 = arith.constant 0.000000e+00 : f32
      %78 = vector.broadcast %cst_38 : f32 to vector<1x1xf32>
      %c0_39 = arith.constant 0 : index
      %c0_40 = arith.constant 0 : index
      %c0_41 = arith.constant 0 : index
      %79 = vector.load %arg5[%c0_39, %c0_40, %c0_41] : memref<1x1x1xf32, #tpu.memory_space<vmem>>, vector<1x1x1xf32>
      %80 = vector.shape_cast %79 : vector<1x1x1xf32> to vector<1x1xf32>
      %81 = vector.shape_cast %78 : vector<1x1xf32> to vector<1x1x1xf32>
      tpu.vector_store %arg5[%c0_39, %c0_40, %c0_41], %81 {strides = array<i32>} : memref<1x1x1xf32, #tpu.memory_space<vmem>>, vector<1x1x1xf32>,
      %cst_42 = arith.constant 0.000000e+00 : f32
      %82 = vector.broadcast %cst_42 : f32 to vector<1x1xf32>
      %c0_43 = arith.constant 0 : index
      %c0_44 = arith.constant 0 : index
      %c0_45 = arith.constant 0 : index
      %83 = vector.load %arg6[%c0_43, %c0_44, %c0_45] : memref<1x1x1xf32, #tpu.memory_space<vmem>>, vector<1x1x1xf32>
      %84 = vector.shape_cast %83 : vector<1x1x1xf32> to vector<1x1xf32>
      %85 = vector.shape_cast %82 : vector<1x1xf32> to vector<1x1x1xf32>
      tpu.vector_store %arg6[%c0_43, %c0_44, %c0_45], %85 {strides = array<i32>} : memref<1x1x1xf32, #tpu.memory_space<vmem>>, vector<1x1x1xf32>,
    } else {
    }
    %c0 = arith.constant 0 : index
    %c0_1 = arith.constant 0 : index
    %c0_2 = arith.constant 0 : index
    %3 = vector.load %arg2[%c0, %c0_1, %c0_2] : memref<8x32x128xf32, #tpu.memory_space<vmem>>, vector<8x32x128xf32>
    %4 = vector.extract_strided_slice %3 {offsets = [0, 0, 1], sizes = [8, 32, 127], strides = [1, 1, 1]} : vector<8x32x128xf32> to vector<8x32x127xf32>
    %5 = vector.extract_strided_slice %3 {offsets = [0, 0, 0], sizes = [8, 32, 127], strides = [1, 1, 1]} : vector<8x32x128xf32> to vector<8x32x127xf32>
    %6 = arith.subf %4, %5 : vector<8x32x127xf32>
    %7 = vector.extract_strided_slice %3 {offsets = [0, 1, 0], sizes = [8, 31, 128], strides = [1, 1, 1]} : vector<8x32x128xf32> to vector<8x31x128xf32>
    %8 = vector.extract_strided_slice %3 {offsets = [0, 0, 0], sizes = [8, 31, 128], strides = [1, 1, 1]} : vector<8x32x128xf32> to vector<8x31x128xf32>
    %9 = arith.subf %7, %8 : vector<8x31x128xf32>
    %10 = vector.extract_strided_slice %6 {offsets = [0, 0, 1], sizes = [8, 32, 126], strides = [1, 1, 1]} : vector<8x32x127xf32> to vector<8x32x126xf32>
    %11 = vector.extract_strided_slice %6 {offsets = [0, 0, 0], sizes = [8, 32, 126], strides = [1, 1, 1]} : vector<8x32x127xf32> to vector<8x32x126xf32>
    %12 = arith.subf %10, %11 : vector<8x32x126xf32>
    %13 = vector.extract_strided_slice %6 {offsets = [0, 1, 0], sizes = [8, 31, 127], strides = [1, 1, 1]} : vector<8x32x127xf32> to vector<8x31x127xf32>
    %14 = vector.extract_strided_slice %6 {offsets = [0, 0, 0], sizes = [8, 31, 127], strides = [1, 1, 1]} : vector<8x32x127xf32> to vector<8x31x127xf32>
    %15 = arith.subf %13, %14 : vector<8x31x127xf32>
    %16 = vector.extract_strided_slice %9 {offsets = [0, 0, 1], sizes = [8, 31, 127], strides = [1, 1, 1]} : vector<8x31x128xf32> to vector<8x31x127xf32>
    %17 = vector.extract_strided_slice %9 {offsets = [0, 0, 0], sizes = [8, 31, 127], strides = [1, 1, 1]} : vector<8x31x128xf32> to vector<8x31x127xf32>
    %18 = arith.subf %16, %17 : vector<8x31x127xf32>
    %19 = vector.extract_strided_slice %9 {offsets = [0, 1, 0], sizes = [8, 30, 128], strides = [1, 1, 1]} : vector<8x31x128xf32> to vector<8x30x128xf32>
    %20 = vector.extract_strided_slice %9 {offsets = [0, 0, 0], sizes = [8, 30, 128], strides = [1, 1, 1]} : vector<8x31x128xf32> to vector<8x30x128xf32>
    %21 = arith.subf %19, %20 : vector<8x30x128xf32>
    %c0_3 = arith.constant 0 : index
    %c0_4 = arith.constant 0 : index
    %c0_5 = arith.constant 0 : index
    %22 = vector.load %arg3[%c0_3, %c0_4, %c0_5] : memref<1x1x1xf32, #tpu.memory_space<vmem>>, vector<1x1x1xf32>
    %23 = vector.shape_cast %22 : vector<1x1x1xf32> to vector<1x1xf32>
    %24 = math.absf %12 : vector<8x32x126xf32>
    %25 = vector.shape_cast %24 : vector<8x32x126xf32> to vector<1x8x32x126xf32>
    %cst = arith.constant dense<0.000000e+00> : vector<1xf32>
    %26 = vector.multi_reduction <add>, %25, %cst [1, 2, 3] : vector<1x8x32x126xf32> to vector<1xf32>
    %27 = vector.shape_cast %26 : vector<1xf32> to vector<1x1x1x1xf32>
    %28 = vector.extract %27[0, 0, 0, 0] : f32 from vector<1x1x1x1xf32>
    %29 = vector.broadcast %28 : f32 to vector<1x1xf32>
    %30 = arith.addf %23, %29 : vector<1x1xf32>
    %c0_6 = arith.constant 0 : index
    %c0_7 = arith.constant 0 : index
    %c0_8 = arith.constant 0 : index
    %31 = vector.load %arg3[%c0_6, %c0_7, %c0_8] : memref<1x1x1xf32, #tpu.memory_space<vmem>>, vector<1x1x1xf32>
    %32 = vector.shape_cast %31 : vector<1x1x1xf32> to vector<1x1xf32>
    %33 = vector.shape_cast %30 : vector<1x1xf32> to vector<1x1x1xf32>
    tpu.vector_store %arg3[%c0_6, %c0_7, %c0_8], %33 {strides = array<i32>} : memref<1x1x1xf32, #tpu.memory_space<vmem>>, vector<1x1x1xf32>,
    %c0_9 = arith.constant 0 : index
    %c0_10 = arith.constant 0 : index
    %c0_11 = arith.constant 0 : index
    %34 = vector.load %arg4[%c0_9, %c0_10, %c0_11] : memref<1x1x1xf32, #tpu.memory_space<vmem>>, vector<1x1x1xf32>
    %35 = vector.shape_cast %34 : vector<1x1x1xf32> to vector<1x1xf32>
    %36 = math.absf %15 : vector<8x31x127xf32>
    %37 = vector.shape_cast %36 : vector<8x31x127xf32> to vector<1x8x31x127xf32>
    %cst_12 = arith.constant dense<0.000000e+00> : vector<1xf32>
    %38 = vector.multi_reduction <add>, %37, %cst_12 [1, 2, 3] : vector<1x8x31x127xf32> to vector<1xf32>
    %39 = vector.shape_cast %38 : vector<1xf32> to vector<1x1x1x1xf32>
    %40 = vector.extract %39[0, 0, 0, 0] : f32 from vector<1x1x1x1xf32>
    %41 = vector.broadcast %40 : f32 to vector<1x1xf32>
    %42 = arith.addf %35, %41 : vector<1x1xf32>
    %c0_13 = arith.constant 0 : index
    %c0_14 = arith.constant 0 : index
    %c0_15 = arith.constant 0 : index
    %43 = vector.load %arg4[%c0_13, %c0_14, %c0_15] : memref<1x1x1xf32, #tpu.memory_space<vmem>>, vector<1x1x1xf32>
    %44 = vector.shape_cast %43 : vector<1x1x1xf32> to vector<1x1xf32>
    %45 = vector.shape_cast %42 : vector<1x1xf32> to vector<1x1x1xf32>
    tpu.vector_store %arg4[%c0_13, %c0_14, %c0_15], %45 {strides = array<i32>} : memref<1x1x1xf32, #tpu.memory_space<vmem>>, vector<1x1x1xf32>,
    %c0_16 = arith.constant 0 : index
    %c0_17 = arith.constant 0 : index
    %c0_18 = arith.constant 0 : index
    %46 = vector.load %arg5[%c0_16, %c0_17, %c0_18] : memref<1x1x1xf32, #tpu.memory_space<vmem>>, vector<1x1x1xf32>
    %47 = vector.shape_cast %46 : vector<1x1x1xf32> to vector<1x1xf32>
    %48 = math.absf %18 : vector<8x31x127xf32>
    %49 = vector.shape_cast %48 : vector<8x31x127xf32> to vector<1x8x31x127xf32>
    %cst_19 = arith.constant dense<0.000000e+00> : vector<1xf32>
    %50 = vector.multi_reduction <add>, %49, %cst_19 [1, 2, 3] : vector<1x8x31x127xf32> to vector<1xf32>
    %51 = vector.shape_cast %50 : vector<1xf32> to vector<1x1x1x1xf32>
    %52 = vector.extract %51[0, 0, 0, 0] : f32 from vector<1x1x1x1xf32>
    %53 = vector.broadcast %52 : f32 to vector<1x1xf32>
    %54 = arith.addf %47, %53 : vector<1x1xf32>
    %c0_20 = arith.constant 0 : index
    %c0_21 = arith.constant 0 : index
    %c0_22 = arith.constant 0 : index
    %55 = vector.load %arg5[%c0_20, %c0_21, %c0_22] : memref<1x1x1xf32, #tpu.memory_space<vmem>>, vector<1x1x1xf32>
    %56 = vector.shape_cast %55 : vector<1x1x1xf32> to vector<1x1xf32>
    %57 = vector.shape_cast %54 : vector<1x1xf32> to vector<1x1x1xf32>
    tpu.vector_store %arg5[%c0_20, %c0_21, %c0_22], %57 {strides = array<i32>} : memref<1x1x1xf32, #tpu.memory_space<vmem>>, vector<1x1x1xf32>,
    %c0_23 = arith.constant 0 : index
    %c0_24 = arith.constant 0 : index
    %c0_25 = arith.constant 0 : index
    %58 = vector.load %arg6[%c0_23, %c0_24, %c0_25] : memref<1x1x1xf32, #tpu.memory_space<vmem>>, vector<1x1x1xf32>
    %59 = vector.shape_cast %58 : vector<1x1x1xf32> to vector<1x1xf32>
    %60 = math.absf %21 : vector<8x30x128xf32>
    %61 = vector.shape_cast %60 : vector<8x30x128xf32> to vector<1x8x30x128xf32>
    %cst_26 = arith.constant dense<0.000000e+00> : vector<1xf32>
    %62 = vector.multi_reduction <add>, %61, %cst_26 [1, 2, 3] : vector<1x8x30x128xf32> to vector<1xf32>
    %63 = vector.shape_cast %62 : vector<1xf32> to vector<1x1x1x1xf32>
    %64 = vector.extract %63[0, 0, 0, 0] : f32 from vector<1x1x1x1xf32>
    %65 = vector.broadcast %64 : f32 to vector<1x1xf32>
    %66 = arith.addf %59, %65 : vector<1x1xf32>
    %c0_27 = arith.constant 0 : index
    %c0_28 = arith.constant 0 : index
    %c0_29 = arith.constant 0 : index
    %67 = vector.load %arg6[%c0_27, %c0_28, %c0_29] : memref<1x1x1xf32, #tpu.memory_space<vmem>>, vector<1x1x1xf32>
    %68 = vector.shape_cast %67 : vector<1x1x1xf32> to vector<1x1xf32>
    %69 = vector.shape_cast %66 : vector<1x1xf32> to vector<1x1x1xf32>
    tpu.vector_store %arg6[%c0_27, %c0_28, %c0_29], %69 {strides = array<i32>} : memref<1x1x1xf32, #tpu.memory_space<vmem>>, vector<1x1x1xf32>,
    return
  }
  func.func @transform_0(%arg0: i32, %arg1: i32) -> (i32, i32, i32) {
    %c1_i32 = arith.constant 1 : i32
    %0 = arith.muli %arg0, %c1_i32 : i32
    %1 = arith.addi %0, %arg1 : i32
    %c0_i32 = arith.constant 0 : i32
    %c0_i32_0 = arith.constant 0 : i32
    %c0_i32_1 = arith.constant 0 : i32
    return %1, %c0_i32, %c0_i32_0 : i32, i32, i32
  }
  func.func @transform_1(%arg0: i32, %arg1: i32) -> (i32, i32, i32) {
    %c0_i32 = arith.constant 0 : i32
    %c0_i32_0 = arith.constant 0 : i32
    %c0_i32_1 = arith.constant 0 : i32
    return %arg0, %c0_i32, %c0_i32_0 : i32, i32, i32
  }
  func.func @transform_2(%arg0: i32, %arg1: i32) -> (i32, i32, i32) {
    %c0_i32 = arith.constant 0 : i32
    %c0_i32_0 = arith.constant 0 : i32
    %c0_i32_1 = arith.constant 0 : i32
    return %arg0, %c0_i32, %c0_i32_0 : i32, i32, i32
  }
  func.func @transform_3(%arg0: i32, %arg1: i32) -> (i32, i32, i32) {
    %c0_i32 = arith.constant 0 : i32
    %c0_i32_0 = arith.constant 0 : i32
    %c0_i32_1 = arith.constant 0 : i32
    return %arg0, %c0_i32, %c0_i32_0 : i32, i32, i32
  }
  func.func @transform_4(%arg0: i32, %arg1: i32) -> (i32, i32, i32) {
    %c0_i32 = arith.constant 0 : i32
    %c0_i32_0 = arith.constant 0 : i32
    %c0_i32_1 = arith.constant 0 : i32
    return %arg0, %c0_i32, %c0_i32_0 : i32, i32, i32
  }
}

</mosaic_0001>

<bundles_post_ra>
// kernel: tpu_custom_call.1
= control target key start
LH: loop header
LB: loop body
LE: loop exit
PB: predicated region body
PF: predicated region fallthrough
CT: control target
= control target key end

     0   :  { %10 = vsyncpa [#allocation3], 0  ;;  %s3603_s0 = inlined_call_operand.hbm [shape: f32[8,32,128], index: 0, kind: input, shape index: {}]   ;;  %s3604_s1 = inlined_call_operand.hbm [shape: f32[1,1,1], index: 1, kind: output, shape index: {0}]   ;;  %s3605_s2 = inlined_call_operand.hbm [shape: f32[1,1,1], index: 2, kind: output, shape index: {1}]   ;;  %s3606_s3 = inlined_call_operand.hbm [shape: f32[1,1,1], index: 3, kind: output, shape index: {2}]   ;;  %s3607_s4 = inlined_call_operand.hbm [shape: f32[1,1,1], index: 4, kind: output, shape index: {3}]  }
   0x1   :  { %11 = vsyncpa [#allocation4], 0 }
   0x2   :  { %12 = vsyncpa [#allocation7], 0 }
   0x3   :  { %13 = vsyncpa [#allocation10], 0  ;;  %s2141_s15 = smov [#allocation2]   ;;  %s2023_s19 = scalar_lea.hbm %s3603_s0, 4096 }
   0x4   :  { %s24_s16 = sshll.u32 %s2141_s15, 4  ;;  %p2024_p0 = scmp.ne.s32.totalorder %s3603_s0, %s2023_s19  ;;  %s25_s16 = int_to_ptr.vmem [resolvable:$true] %s24_s16 }
   0x5   :  { %p2027_p1 = scmp.lt.u32.totalorder %s2023_s19, %s3603_s0 }
   0x7   :  { %p2029_p2 = pnand %p2027_p1, %p2024_p0 }
   0x9   :  { %2032 = shalt.err (!%p2029_p2)
}
   0xa   :  { %s2033_s24 = scalar_lea.vmem %s25_s16, 4096  ;;  %p2038_p4 = scmp.lt.s32.totalorder %s25_s16, %s25_s16 }
   0xb   :  { %p2034_p3 = scmp.ne.s32.totalorder %s25_s16, %s2033_s24  ;;  %p2039_p5 = scmp.lt.s32.totalorder %s2033_s24, %s2033_s24 }
   0xd   :  { %p2040_p6 = por %p2039_p5, %p2038_p4 }
   0xf   :  { %p2041_p7 = pnand %p2040_p6, %p2034_p3 }
  0x11   :  { %2044 = shalt.err (!%p2041_p7)
}
  0x12   :  { %s2142_s25 = smov 128   ;;  %s2143_s26 = smov 8  }
  0x13   :  { %30 = dma.hbm_to_vmem [thread:$0]  %s3603_s0, 4096, %s25_s16, [#allocation3], %s2142_s25, %s2142_s25, %s2143_s26  }
  0x14   :  { %2133 = dma.done.wait [#allocation3], 4096  }
  0x15   :  { %2134 = vsyncadd [#allocation3], 4294963200  ;;  %v2189_v0 = vld [vmem:[#allocation2 + $0x10] sm:$0xff]  ;;  %v2191_v1 = vld [vmem:[#allocation2] sm:$0xff]  ;;  %s2144_s29 = smov 1   ;;  %vm237_vm0 = vcmask 1040384  }
  0x16   :  { %113 = vrot.lane.b32.xlu1 %v2189_v0, %s2144_s29  ;;  %109 = vrot.lane.b32.xlu0 %v2191_v1, %s2144_s29  ;;  %v2197_v2 = vld [vmem:[#allocation2 + $0x18] sm:$0xff]  ;;  %v2199_v3 = vld [vmem:[#allocation2 + $0x8] sm:$0xff]  ;;  %v2207_v5 = vld [vmem:[#allocation2 + $0x20] sm:$0xff]  ;;  %vm1221_vm1 = vcmask 1046528   ;;  %s2145_s0 = smov 127   ;;  %s2146_s30 = smov 126  }
  0x17   :  { %v2205_v4 = vld [vmem:[#allocation2 + $0x28] sm:$0xff]  ;;  %v2213_v6 = vld [vmem:[#allocation2 + $0x38] sm:$0xff]  ;;  %v2215_v7 = vld [vmem:[#allocation2 + $0x30] sm:$0xff]  ;;  %vm1374_vm2 = vcmask 1039360   ;;  %vm1380_vm3 = vcmask 1038336   ;;  %vm1079_vm4 = vcmask 1031168  }
  0x18   :  { %v2221_v8 = vld [vmem:[#allocation2 + $0x48] sm:$0xff]  ;;  %v2223_v9 = vld [vmem:[#allocation2 + $0x40] sm:$0xff]  ;;  %v2229_v10 = vld [vmem:[#allocation2 + $0x58] sm:$0xff]  ;;  %vm1808_vm5 = vcmask 1045504   ;;  %vm40_vm6 = vcmask 0   ;;  %s2148_s5 = smov [#allocation6]  }
  0x19   :  { %v2231_v11 = vld [vmem:[#allocation2 + $0x50] sm:$0xff]  ;;  %v2237_v12 = vld [vmem:[#allocation2 + $0x68] sm:$0xff]  ;;  %v2239_v13 = vld [vmem:[#allocation2 + $0x60] sm:$0xff]  ;;  %s1964_s6 = sshll.u32 %s2148_s5, 4  ;;  %s2149_s7 = smov [#allocation5]   ;;  %s3527_s6 = int_to_ptr.vmem [resolvable:$true] %s1964_s6 }
  0x1a   :  { %115 = vrot.lane.b32.xlu1 %v2197_v2, %s2144_s29  ;;  %111 = vrot.lane.b32.xlu0 %v2199_v3, %s2144_s29  ;;  %v2245_v14 = vld [vmem:[#allocation2 + $0x78] sm:$0xff]  ;;  %v2247_v15 = vld [vmem:[#allocation2 + $0x70] sm:$0xff]  ;;  %v2253_v16 = vld [vmem:[#allocation2 + $0x88] sm:$0xff]  ;;  %s1954_s8 = sshll.u32 %s2149_s7, 4  ;;  %s2150_s10 = smov [#allocation8]   ;;  %s1955_s8 = int_to_ptr.vmem [resolvable:$true] %s1954_s8 }
  0x1b   :  { %v2255_v17 = vld [vmem:[#allocation2 + $0x80] sm:$0xff]  ;;  %v2261_v18 = vld [vmem:[#allocation2 + $0x98] sm:$0xff]  ;;  %v2263_v19 = vld [vmem:[#allocation2 + $0x90] sm:$0xff]  ;;  %s1974_s11 = sshll.u32 %s2150_s10, 4  ;;  %s2151_s13 = smov [#allocation9]   ;;  %s3529_s11 = int_to_ptr.vmem [resolvable:$true] %s1974_s11 }
  0x1c   :  { %v2269_v20 = vld [vmem:[#allocation2 + $0xa8] sm:$0xff]  ;;  %v2271_v21 = vld [vmem:[#allocation2 + $0xa0] sm:$0xff]  ;;  %v2277_v22 = vld [vmem:[#allocation2 + $0xb8] sm:$0xff]  ;;  %s1984_s14 = sshll.u32 %s2151_s13, 4  ;;  %s2045_s17 = scalar_lea.vmem %s1955_s8, 16  ;;  %s3532_s14 = int_to_ptr.vmem [resolvable:$true] %s1984_s14 }
  0x1d   :  { %v2279_v23 = vld [vmem:[#allocation2 + $0xb0] sm:$0xff]  ;;  %v2285_v24 = vld [vmem:[#allocation2 + $0xc8] sm:$0xff]  ;;  %v2287_v25 = vld [vmem:[#allocation2 + $0xc0] sm:$0xff]  ;;  %p2046_p8 = scmp.ne.s32.totalorder %s1955_s8, %s2045_s17  ;;  %s2049_s18 = scalar_lea.vmem %s1955_s8, 32 }
  0x1e   :  { %119 = vrot.lane.b32.xlu1 %v2205_v4, %s2144_s29  ;;  %117 = vrot.lane.b32.xlu0 %v2207_v5, %s2144_s29  ;;  %v2293_v26 = vld [vmem:[#allocation2 + $0xd8] sm:$0xff]  ;;  %v2295_v27 = vld [vmem:[#allocation2 + $0xd0] sm:$0xff]  ;;  %v2301_v28 = vld [vmem:[#allocation2 + $0xe8] sm:$0xff]  ;;  %p2050_p9 = scmp.lt.s32.totalorder %s1955_s8, %s1955_s8  ;;  %p2051_p10 = scmp.lt.s32.totalorder %s2049_s18, %s2045_s17 }
  0x1f   :  { %v2303_v29 = vld [vmem:[#allocation2 + $0xe0] sm:$0xff]  ;;  %v2309_v30 = vld [vmem:[#allocation2 + $0xf8] sm:$0xff]  ;;  %v2311_v31 = vld [vmem:[#allocation2 + $0xf0] sm:$0xff] }
  0x20   :  { %p2052_p11 = por %p2051_p10, %p2050_p9 }
  0x22   :  { %123 = vrot.lane.b32.xlu1 %v2213_v6, %s2144_s29  ;;  %121 = vrot.lane.b32.xlu0 %v2215_v7, %s2144_s29  ;;  %p2053_p12 = pnand %p2052_p11, %p2046_p8 }
  0x26   :  { %127 = vrot.lane.b32.xlu1 %v2221_v8, %s2144_s29  ;;  %125 = vrot.lane.b32.xlu0 %v2223_v9, %s2144_s29 }
  0x2a   :  { %131 = vrot.lane.b32.xlu1 %v2229_v10, %s2144_s29  ;;  %129 = vrot.lane.b32.xlu0 %v2231_v11, %s2144_s29 }
  0x2e   :  { %135 = vrot.lane.b32.xlu1 %v2237_v12, %s2144_s29  ;;  %133 = vrot.lane.b32.xlu0 %v2239_v13, %s2144_s29 }
  0x32   :  { %139 = vrot.lane.b32.xlu1 %v2245_v14, %s2144_s29  ;;  %137 = vrot.lane.b32.xlu0 %v2247_v15, %s2144_s29 }
  0x36   :  { %143 = vrot.lane.b32.xlu1 %v2253_v16, %s2144_s29  ;;  %141 = vrot.lane.b32.xlu0 %v2255_v17, %s2144_s29 }
  0x3a   :  { %147 = vrot.lane.b32.xlu1 %v2261_v18, %s2144_s29  ;;  %145 = vrot.lane.b32.xlu0 %v2263_v19, %s2144_s29 }
  0x3e   :  { %151 = vrot.lane.b32.xlu1 %v2269_v20, %s2144_s29  ;;  %149 = vrot.lane.b32.xlu0 %v2271_v21, %s2144_s29 }
  0x42   :  { %155 = vrot.lane.b32.xlu1 %v2277_v22, %s2144_s29  ;;  %153 = vrot.lane.b32.xlu0 %v2279_v23, %s2144_s29 }
  0x46   :  { %159 = vrot.lane.b32.xlu1 %v2285_v24, %s2144_s29  ;;  %157 = vrot.lane.b32.xlu0 %v2287_v25, %s2144_s29 }
  0x4a   :  { %163 = vrot.lane.b32.xlu1 %v2293_v26, %s2144_s29  ;;  %161 = vrot.lane.b32.xlu0 %v2295_v27, %s2144_s29 }
  0x4e   :  { %167 = vrot.lane.b32.xlu1 %v2301_v28, %s2144_s29  ;;  %165 = vrot.lane.b32.xlu0 %v2303_v29, %s2144_s29 }
  0x52   :  { %171 = vrot.lane.b32.xlu1 %v2309_v30, %s2144_s29  ;;  %169 = vrot.lane.b32.xlu0 %v2311_v31, %s2144_s29 }
  0x88   :  { %v114_v32 = vpop.permute.xlu1 %113  ;;  %v110_v33 = vpop.permute.xlu0 %109 }
  0x89   :  { %v2318_v34 = vsub.f32 %v2191_v1, %v110_v33  ;;  %v2321_v35 = vsub.f32 %v2189_v0, %v114_v32 }
  0x8b   :  { %390 = vrot.lane.b32.xlu0 %v2318_v34, %s2144_s29 }
  0x8c   :  { %v116_v36 = vpop.permute.xlu1 %115  ;;  %v112_v37 = vpop.permute.xlu0 %111 }
  0x8d   :  { %v2326_v38 = vsub.f32 %v2199_v3, %v112_v37  ;;  %v2333_v41 = vsub.f32 %v2197_v2, %v116_v36 }
  0x8f   :  { %394 = vrot.lane.b32.xlu0 %v2321_v35, %s2144_s29  ;;  %392 = vrot.lane.b32.xlu1 %v2326_v38, %s2144_s29 }
  0x90   :  { %v120_v39 = vpop.permute.xlu1 %119  ;;  %v118_v40 = vpop.permute.xlu0 %117 }
  0x91   :  { %v2336_v42 = vsub.f32 %v2207_v5, %v118_v40  ;;  %v2343_v45 = vsub.f32 %v2205_v4, %v120_v39 }
  0x93   :  { %396 = vrot.lane.b32.xlu1 %v2333_v41, %s2144_s29  ;;  %398 = vrot.lane.b32.xlu0 %v2336_v42, %s2144_s29 }
  0x94   :  { %v124_v43 = vpop.permute.xlu1 %123  ;;  %v122_v44 = vpop.permute.xlu0 %121 }
  0x95   :  { %v2346_v46 = vsub.f32 %v2215_v7, %v122_v44  ;;  %v2353_v49 = vsub.f32 %v2213_v6, %v124_v43 }
  0x97   :  { %400 = vrot.lane.b32.xlu1 %v2343_v45, %s2144_s29  ;;  %402 = vrot.lane.b32.xlu0 %v2346_v46, %s2144_s29 }
  0x98   :  { %v128_v47 = vpop.permute.xlu1 %127  ;;  %v126_v48 = vpop.permute.xlu0 %125 }
  0x99   :  { %v2356_v50 = vsub.f32 %v2223_v9, %v126_v48  ;;  %v2363_v53 = vsub.f32 %v2221_v8, %v128_v47 }
  0x9b   :  { %404 = vrot.lane.b32.xlu1 %v2353_v49, %s2144_s29  ;;  %406 = vrot.lane.b32.xlu0 %v2356_v50, %s2144_s29 }
  0x9c   :  { %v132_v51 = vpop.permute.xlu1 %131  ;;  %v130_v52 = vpop.permute.xlu0 %129 }
  0x9d   :  { %v2366_v54 = vsub.f32 %v2231_v11, %v130_v52  ;;  %v2373_v57 = vsub.f32 %v2229_v10, %v132_v51 }
  0x9f   :  { %408 = vrot.lane.b32.xlu1 %v2363_v53, %s2144_s29  ;;  %410 = vrot.lane.b32.xlu0 %v2366_v54, %s2144_s29 }
  0xa0   :  { %v136_v55 = vpop.permute.xlu1 %135  ;;  %v134_v56 = vpop.permute.xlu0 %133 }
  0xa1   :  { %v2376_v58 = vsub.f32 %v2239_v13, %v134_v56  ;;  %v2383_v61 = vsub.f32 %v2237_v12, %v136_v55 }
  0xa3   :  { %412 = vrot.lane.b32.xlu1 %v2373_v57, %s2144_s29  ;;  %414 = vrot.lane.b32.xlu0 %v2376_v58, %s2144_s29 }
  0xa4   :  { %v140_v59 = vpop.permute.xlu1 %139  ;;  %v138_v60 = vpop.permute.xlu0 %137 }
  0xa5   :  { %v2386_v62 = vsub.f32 %v2247_v15, %v138_v60  ;;  %v2393_v33 = vsub.f32 %v2245_v14, %v140_v59 }
  0xa7   :  { %416 = vrot.lane.b32.xlu1 %v2383_v61, %s2144_s29  ;;  %418 = vrot.lane.b32.xlu0 %v2386_v62, %s2144_s29 }
  0xa8   :  { %v144_v63 = vpop.permute.xlu1 %143  ;;  %v142_v32 = vpop.permute.xlu0 %141 }
  0xa9   :  { %v2396_v36 = vsub.f32 %v2255_v17, %v142_v32  ;;  %v2403_v40 = vsub.f32 %v2253_v16, %v144_v63 }
  0xab   :  { %3683 = vst [vmem:[#allocation15_spill] sm:$0xff] %v2396_v36  ;;  %420 = vrot.lane.b32.xlu1 %v2393_v33, %s2144_s29  ;;  %422 = vrot.lane.b32.xlu0 %v2396_v36, %s2144_s29  ;;  %3684 = vst [vmem:[#allocation16_spill] sm:$0xff] %v2403_v40 }
  0xac   :  { %v148_v37 = vpop.permute.xlu1 %147  ;;  %v146_v39 = vpop.permute.xlu0 %145 }
  0xad   :  { %v2406_v43 = vsub.f32 %v2263_v19, %v146_v39  ;;  %v2413_v48 = vsub.f32 %v2261_v18, %v148_v37 }
  0xaf   :  { %3685 = vst [vmem:[#allocation17_spill] sm:$0xff] %v2406_v43  ;;  %424 = vrot.lane.b32.xlu1 %v2403_v40, %s2144_s29  ;;  %426 = vrot.lane.b32.xlu0 %v2406_v43, %s2144_s29  ;;  %3686 = vst [vmem:[#allocation18_spill] sm:$0xff] %v2413_v48 }
  0xb0   :  { %v152_v44 = vpop.permute.xlu1 %151  ;;  %v150_v47 = vpop.permute.xlu0 %149 }
  0xb1   :  { %v2416_v51 = vsub.f32 %v2271_v21, %v150_v47  ;;  %v2423_v56 = vsub.f32 %v2269_v20, %v152_v44 }
  0xb3   :  { %3687 = vst [vmem:[#allocation19_spill] sm:$0xff] %v2416_v51  ;;  %428 = vrot.lane.b32.xlu1 %v2413_v48, %s2144_s29  ;;  %430 = vrot.lane.b32.xlu0 %v2416_v51, %s2144_s29  ;;  %3688 = vst [vmem:[#allocation20_spill] sm:$0xff] %v2423_v56 }
  0xb4   :  { %v156_v52 = vpop.permute.xlu1 %155  ;;  %v154_v55 = vpop.permute.xlu0 %153 }
  0xb5   :  { %v2426_v59 = vsub.f32 %v2279_v23, %v154_v55  ;;  %v2433_v32 = vsub.f32 %v2277_v22, %v156_v52 }
  0xb7   :  { %3689 = vst [vmem:[#allocation21_spill] sm:$0xff] %v2426_v59  ;;  %432 = vrot.lane.b32.xlu1 %v2423_v56, %s2144_s29  ;;  %434 = vrot.lane.b32.xlu0 %v2426_v59, %s2144_s29  ;;  %3690 = vst [vmem:[#allocation22_spill] sm:$0xff] %v2433_v32  ;;  %v245_v56 = vrot.slane %v2207_v5, 7 }
  0xb8   :  { %v160_v60 = vpop.permute.xlu1 %159  ;;  %v158_v63 = vpop.permute.xlu0 %157 }
  0xb9   :  { %v2436_v37 = vsub.f32 %v2287_v25, %v158_v63  ;;  %v2443_v47 = vsub.f32 %v2285_v24, %v160_v60  ;;  %v238_v60 = vrot.slane %v2191_v1, 7 }
  0xbb   :  { %3691 = vst [vmem:[#allocation23_spill] sm:$0xff] %v2436_v37  ;;  %436 = vrot.lane.b32.xlu1 %v2433_v32, %s2144_s29  ;;  %438 = vrot.lane.b32.xlu0 %v2436_v37, %s2144_s29  ;;  %3692 = vst [vmem:[#allocation24_spill] sm:$0xff] %v2443_v47 }
  0xbc   :  { %v164_v39 = vpop.permute.xlu1 %163  ;;  %v162_v44 = vpop.permute.xlu0 %161 }
  0xbd   :  { %v2446_v55 = vsub.f32 %v2295_v27, %v162_v44  ;;  %v2453_v32 = vsub.f32 %v2293_v26, %v164_v39  ;;  %v241_v44 = vrot.slane %v2189_v0, 7 }
  0xbf   :  { %3693 = vst [vmem:[#allocation25_spill] sm:$0xff] %v2446_v55  ;;  %440 = vrot.lane.b32.xlu1 %v2443_v47, %s2144_s29  ;;  %442 = vrot.lane.b32.xlu0 %v2446_v55, %s2144_s29  ;;  %3694 = vst [vmem:[#allocation26_spill] sm:$0xff] %v2453_v32  ;;  %v239_v55 = vrot.slane %v2199_v3, 7 }
  0xc0   :  { %v168_v52 = vpop.permute.xlu1 %167  ;;  %v166_v63 = vpop.permute.xlu0 %165 }
  0xc1   :  { %v2456_v37 = vsub.f32 %v2303_v29, %v166_v63  ;;  %v2466_v59 = vsub.f32 %v2301_v28, %v168_v52  ;;  %v242_v51 = vsel %vm237_vm0, %v239_v55, %v241_v44  ;;  %v240_v52 = vsel %vm237_vm0, %v238_v60, %v239_v55 }
  0xc2   :  { %v248_v55 = vrot.slane %v2215_v7, 7 }
  0xc3   :  { %3695 = vst [vmem:[#allocation27_spill] sm:$0xff] %v2456_v37  ;;  %444 = vrot.lane.b32.xlu1 %v2453_v32, %s2144_s29  ;;  %446 = vrot.lane.b32.xlu0 %v2456_v37, %s2144_s29  ;;  %3696 = vst [vmem:[#allocation28_spill] sm:$0xff] %v2466_v59  ;;  %v2476_v37 = vsub.f32 %v2191_v1, %v238_v60  ;;  %v243_v32 = vrot.slane %v2197_v2, 7  ;;  %v2490_v1 = vsub.f32 %v2189_v0, %v242_v51 }
  0xc4   :  { %v170_v47 = vpop.permute.xlu0 %169  ;;  %v172_v63 = vpop.permute.xlu1 %171 }
  0xc5   :  { %v2469_v39 = vsub.f32 %v2311_v31, %v170_v47  ;;  %3698 = vst [vmem:[#allocation30_spill] sm:$0xff] %v2476_v37  ;;  %v2482_v47 = vsub.f32 %v2309_v30, %v172_v63  ;;  %3700 = vst [vmem:[#allocation32_spill] sm:$0xff] %v2490_v1  ;;  %v244_v60 = vsel %vm237_vm0, %v241_v44, %v243_v32  ;;  %v252_v32 = vrot.slane %v2223_v9, 7 }
  0xc6   :  { %v2503_v63 = vsub.f32 %v2207_v5, %v245_v56  ;;  %v2506_v0 = vsub.f32 %v2197_v2, %v244_v60  ;;  %v253_v44 = vrot.slane %v2221_v8, 7  ;;  %v255_v60 = vrot.slane %v2231_v11, 7 }
  0xc7   :  { %3697 = vst [vmem:[#allocation29_spill] sm:$0xff] %v2469_v39  ;;  %448 = vrot.lane.b32.xlu1 %v2466_v59, %s2144_s29  ;;  %450 = vrot.lane.b32.xlu0 %v2469_v39, %s2144_s29  ;;  %3699 = vst [vmem:[#allocation31_spill] sm:$0xff] %v2482_v47  ;;  %v2493_v39 = vsub.f32 %v2199_v3, %v240_v52  ;;  %v246_v59 = vrot.slane %v2205_v4, 7  ;;  %v250_v3 = vrot.slane %v2213_v6, 7 }
  0xc8   :  { %3702 = vst [vmem:[#allocation34_spill] sm:$0xff] %v2503_v63 }
  0xc9   :  { %3701 = vst [vmem:[#allocation33_spill] sm:$0xff] %v2493_v39  ;;  %v249_v51 = vsel %vm237_vm0, %v246_v59, %v248_v55  ;;  %v247_v52 = vsel %vm237_vm0, %v245_v56, %v246_v59  ;;  %v251_v56 = vsel %vm237_vm0, %v248_v55, %v250_v3  ;;  %v2530_v59 = vsub.f32 %v2223_v9, %v252_v32 }
  0xca   :  { %v2517_v5 = vsub.f32 %v2215_v7, %v249_v51  ;;  %v2520_v2 = vsub.f32 %v2205_v4, %v247_v52  ;;  %v2533_v7 = vsub.f32 %v2213_v6, %v251_v56  ;;  %v257_v4 = vrot.slane %v2229_v10, 7 }
  0xcb   :  { %452 = vrot.lane.b32.xlu1 %v2482_v47, %s2144_s29  ;;  %670 = vrot.lane.b32.xlu0 %v2476_v37, %s2144_s29  ;;  %v256_v51 = vsel %vm237_vm0, %v253_v44, %v255_v60  ;;  %v254_v52 = vsel %vm237_vm0, %v252_v32, %v253_v44  ;;  %v259_v55 = vrot.slane %v2239_v13, 7  ;;  %v260_v3 = vrot.slane %v2237_v12, 7 }
  0xcc   :  { %v2544_v9 = vsub.f32 %v2231_v11, %v256_v51  ;;  %v2547_v6 = vsub.f32 %v2221_v8, %v254_v52  ;;  %v262_v56 = vrot.slane %v2247_v15, 7  ;;  %v258_v32 = vsel %vm237_vm0, %v255_v60, %v257_v4 }
  0xcd   :  { %v2557_v44 = vsub.f32 %v2239_v13, %v259_v55  ;;  %v2560_v11 = vsub.f32 %v2229_v10, %v258_v32  ;;  %v264_v8 = vrot.slane %v2245_v14, 7  ;;  %v261_v52 = vsel %vm237_vm0, %v259_v55, %v260_v3 }
  0xce   :  { %v263_v51 = vsel %vm237_vm0, %v260_v3, %v262_v56  ;;  %v266_v60 = vrot.slane %v2255_v17, 7  ;;  %v2574_v10 = vsub.f32 %v2237_v12, %v261_v52  ;;  %v267_v4 = vrot.slane %v2253_v16, 7 }
  0xcf   :  { %674 = vrot.lane.b32.xlu0 %v2490_v1, %s2144_s29  ;;  %672 = vrot.lane.b32.xlu1 %v2493_v39, %s2144_s29  ;;  %v2571_v13 = vsub.f32 %v2247_v15, %v263_v51  ;;  %v269_v32 = vrot.slane %v2263_v19, 7  ;;  %v265_v55 = vsel %vm237_vm0, %v262_v56, %v264_v8  ;;  %v271_v12 = vrot.slane %v2261_v18, 7 }
  0xd0   :  { %v2584_v3 = vsub.f32 %v2255_v17, %v266_v60  ;;  %v2587_v15 = vsub.f32 %v2245_v14, %v265_v55  ;;  %v268_v52 = vsel %vm237_vm0, %v266_v60, %v267_v4  ;;  %v273_v56 = vrot.slane %v2271_v21, 7 }
  0xd1   :  { %v270_v51 = vsel %vm237_vm0, %v267_v4, %v269_v32  ;;  %v2601_v14 = vsub.f32 %v2253_v16, %v268_v52  ;;  %v274_v8 = vrot.slane %v2269_v20, 7  ;;  %v276_v55 = vrot.slane %v2279_v23, 7 }
  0xd2   :  { %3703 = vst [vmem:[#allocation35_spill] sm:$0xff] %v2584_v3  ;;  %3704 = vst [vmem:[#allocation36_spill] sm:$0xff] %v2587_v15  ;;  %v2598_v17 = vsub.f32 %v2263_v19, %v270_v51  ;;  %v272_v60 = vsel %vm237_vm0, %v269_v32, %v271_v12  ;;  %v2611_v4 = vsub.f32 %v2271_v21, %v273_v56  ;;  %v278_v16 = vrot.slane %v2277_v22, 7 }
  0xd3   :  { %678 = vrot.lane.b32.xlu0 %v2503_v63, %s2144_s29  ;;  %676 = vrot.lane.b32.xlu1 %v2506_v0, %s2144_s29  ;;  %3706 = vst [vmem:[#allocation38_spill] sm:$0xff] %v2601_v14  ;;  %v2614_v19 = vsub.f32 %v2261_v18, %v272_v60  ;;  %v277_v51 = vsel %vm237_vm0, %v274_v8, %v276_v55  ;;  %v280_v32 = vrot.slane %v2287_v25, 7  ;;  %v281_v12 = vrot.slane %v2285_v24, 7 }
  0xd4   :  { %3705 = vst [vmem:[#allocation37_spill] sm:$0xff] %v2598_v17  ;;  %3707 = vst [vmem:[#allocation39_spill] sm:$0xff] %v2611_v4  ;;  %v275_v52 = vsel %vm237_vm0, %v273_v56, %v274_v8  ;;  %v2625_v21 = vsub.f32 %v2279_v23, %v277_v51  ;;  %v283_v60 = vrot.slane %v2295_v27, 7  ;;  %v279_v56 = vsel %vm237_vm0, %v276_v55, %v278_v16 }
  0xd5   :  { %3708 = vst [vmem:[#allocation40_spill] sm:$0xff] %v2614_v19  ;;  %v2628_v18 = vsub.f32 %v2269_v20, %v275_v52  ;;  %v519_v8 = vrot.slane %v2326_v38, 7  ;;  %v2639_v23 = vsub.f32 %v2287_v25, %v280_v32  ;;  %v2642_v20 = vsub.f32 %v2277_v22, %v279_v56 }
  0xd6   :  { %3709 = vst [vmem:[#allocation41_spill] sm:$0xff] %v2625_v21  ;;  %v285_v51 = vrot.slane %v2293_v26, 7  ;;  %v284_v52 = vsel %vm237_vm0, %v281_v12, %v283_v60  ;;  %v282_v55 = vsel %vm237_vm0, %v280_v32, %v281_v12  ;;  %v518_v16 = vrot.slane %v2318_v34, 7 }
  0xd7   :  { %682 = vrot.lane.b32.xlu0 %v2517_v5, %s2144_s29  ;;  %680 = vrot.lane.b32.xlu1 %v2520_v2, %s2144_s29  ;;  %3710 = vst [vmem:[#allocation42_spill] sm:$0xff] %v2628_v18  ;;  %3711 = vst [vmem:[#allocation43_spill] sm:$0xff] %v2639_v23  ;;  %v287_v47 = vrot.slane %v2303_v29, 7  ;;  %v2655_v22 = vsub.f32 %v2295_v27, %v284_v52  ;;  %v2658_v25 = vsub.f32 %v2285_v24, %v282_v55 }
  0xd8   :  { %3712 = vst [vmem:[#allocation44_spill] sm:$0xff] %v2642_v20  ;;  %v520_v32 = vsel %vm237_vm0, %v518_v16, %v519_v8  ;;  %v288_v12 = vrot.slane %v2301_v28, 7  ;;  %v290_v56 = vrot.slane %v2311_v31, 7  ;;  %v3717_v52 = vrot.slane %v2321_v35, 7 }
  0xd9   :  { %3713 = vst [vmem:[#allocation45_spill] sm:$0xff] %v2655_v22  ;;  %3714 = vst [vmem:[#allocation46_spill] sm:$0xff] %v2658_v25  ;;  %v2672_v24 = vsub.f32 %v2303_v29, %v287_v47 }
  0xda   :  { %v291_v55 = vsel %vm237_vm0, %v288_v12, %v290_v56 }
  0xdb   :  { %686 = vrot.lane.b32.xlu0 %v2530_v59, %s2144_s29  ;;  %684 = vrot.lane.b32.xlu1 %v2533_v7, %s2144_s29  ;;  %3715 = vst [vmem:[#allocation47_spill] sm:$0xff] %v2672_v24 }
  0xdf   :  { %690 = vrot.lane.b32.xlu0 %v2544_v9, %s2144_s29  ;;  %688 = vrot.lane.b32.xlu1 %v2547_v6, %s2144_s29 }
  0xe3   :  { %694 = vrot.lane.b32.xlu0 %v2557_v44, %s2144_s29  ;;  %692 = vrot.lane.b32.xlu1 %v2560_v11, %s2144_s29 }
  0xe7   :  { %698 = vrot.lane.b32.xlu0 %v2571_v13, %s2144_s29  ;;  %696 = vrot.lane.b32.xlu1 %v2574_v10, %s2144_s29 }
  0xeb   :  { %702 = vrot.lane.b32.xlu0 %v2584_v3, %s2144_s29  ;;  %700 = vrot.lane.b32.xlu1 %v2587_v15, %s2144_s29 }
  0xef   :  { %706 = vrot.lane.b32.xlu0 %v2598_v17, %s2144_s29  ;;  %704 = vrot.lane.b32.xlu1 %v2601_v14, %s2144_s29 }
  0xf3   :  { %710 = vrot.lane.b32.xlu0 %v2611_v4, %s2144_s29  ;;  %708 = vrot.lane.b32.xlu1 %v2614_v19, %s2144_s29 }
  0xf7   :  { %714 = vrot.lane.b32.xlu0 %v2625_v21, %s2144_s29  ;;  %712 = vrot.lane.b32.xlu1 %v2628_v18, %s2144_s29  ;;  %v286_v21 = vsel %vm237_vm0, %v283_v60, %v285_v51  ;;  %v522_v60 = vsel %vm237_vm0, %v519_v8, %v3717_v52  ;;  %v292_v51 = vrot.slane %v2309_v30, 7 }
  0xf8   :  { %v2675_v27 = vsub.f32 %v2293_v26, %v286_v21  ;;  %v608_v26 = vsub.f32 %v2321_v35, %v522_v60  ;;  %v2694_v21 = vsub.f32 %v2311_v31, %v291_v55 }
  0xfa   :  { %3716 = vst [vmem:[#allocation48_spill] sm:$0xff] %v2675_v27  ;;  %3718 = vst [vmem:[#allocation49_spill] sm:$0xff] %v2694_v21  ;;  %v2704_v60 = vand.u32 2147483647, %v608_v26 }
  0xfb   :  { %718 = vrot.lane.b32.xlu0 %v2639_v23, %s2144_s29  ;;  %716 = vrot.lane.b32.xlu1 %v2642_v20, %s2144_s29  ;;  %v607_v23 = vsub.f32 %v2326_v38, %v520_v32  ;;  %v289_v32 = vsel %vm237_vm0, %v287_v47, %v288_v12 }
  0xfc   :  { %v2697_v47 = vsub.f32 %v2301_v28, %v289_v32  ;;  %v3652_v55 = vrot.slane %v2704_v60, 1 }
  0xfd   :  { %v2664_v18 = vpop.permute.xlu0 %390  ;;  %v1158_v29 = vand.u32 2147483647, %v607_v23 }
  0xfe   :  { %3719 = vst [vmem:[#allocation50_spill] sm:$0xff] %v2697_v47 }
  0xff   :  { %722 = vrot.lane.b32.xlu0 %v2655_v22, %s2144_s29  ;;  %720 = vrot.lane.b32.xlu1 %v2658_v25, %s2144_s29  ;;  %v606_v22 = vsub.f32 %v2318_v34, %v518_v16  ;;  %v293_v16 = vsel %vm237_vm0, %v290_v56, %v292_v51  ;;  %v1223_v52 = vrot.slane %v1158_v29, 1 }
 0x100   :  { %v2711_v28 = vsub.f32 %v2309_v30, %v293_v16 }
 0x101   :  { %v2684_v20 = vpop.permute.xlu1 %392  ;;  %v2686_v25 = vpop.permute.xlu0 %394  ;;  %v1157_v8 = vand.u32 2147483647, %v606_v22  ;;  %v1226_v30 = vsel %vm1221_vm1, %v1223_v52, %v3652_v55 }
 0x102   :  { %3720 = vst [vmem:[#allocation51_spill] sm:$0xff] %v2711_v28 }
 0x103   :  { %726 = vrot.lane.b32.xlu0 %v2672_v24, %s2144_s29  ;;  %724 = vrot.lane.b32.xlu1 %v2675_v27, %s2144_s29  ;;  %v1222_v31 = vrot.slane %v1157_v8, 1 }
 0x105   :  { %v2700_v12 = vpop.permute.xlu1 %396  ;;  %v2702_v23 = vpop.permute.xlu0 %398  ;;  %v1224_v51 = vsel %vm1221_vm1, %v1222_v31, %v1223_v52 }
 0x107   :  { %730 = vrot.lane.b32.xlu0 %v2694_v21, %s2144_s29  ;;  %728 = vrot.lane.b32.xlu1 %v2697_v47, %s2144_s29 }
 0x109   :  { %v2713_v22 = vpop.permute.xlu1 %400  ;;  %v2715_v56 = vpop.permute.xlu0 %402 }
 0x10b   :  { %1278 = vrot.lane.b32.xlu0 %v1224_v51, %s2145_s0  ;;  %732 = vrot.lane.b32.xlu1 %v2711_v28, %s2144_s29 }
 0x10d   :  { %v2722_v32 = vpop.permute.xlu1 %404  ;;  %v2724_v29 = vpop.permute.xlu0 %406 }
 0x10f   :  { %1280 = vrot.lane.b32.xlu1 %v1226_v30, %s2145_s0 }
 0x111   :  { %v2730_v26 = vpop.permute.xlu1 %408  ;;  %v2732_v8 = vpop.permute.xlu0 %410 }
 0x115   :  { %v2734_v16 = vpop.permute.xlu1 %412  ;;  %v2736_v31 = vpop.permute.xlu0 %414 }
 0x119   :  { %v2738_v51 = vpop.permute.xlu1 %416  ;;  %v2740_v28 = vpop.permute.xlu0 %418 }
 0x11a   :  { %3721 = vst [vmem:[#allocation52_spill] sm:$0xff] %v2738_v51  ;;  %3722 = vst [vmem:[#allocation53_spill] sm:$0xff] %v2740_v28 }
 0x11d   :  { %v2742_v21 = vpop.permute.xlu1 %420  ;;  %v2744_v47 = vpop.permute.xlu0 %422 }
 0x11e   :  { %3723 = vst [vmem:[#allocation54_spill] sm:$0xff] %v2742_v21  ;;  %3724 = vst [vmem:[#allocation55_spill] sm:$0xff] %v2744_v47 }
 0x121   :  { %v2746_v24 = vpop.permute.xlu1 %424  ;;  %v2748_v52 = vpop.permute.xlu0 %426 }
 0x122   :  { %3725 = vst [vmem:[#allocation56_spill] sm:$0xff] %v2746_v24  ;;  %3726 = vst [vmem:[#allocation57_spill] sm:$0xff] %v2748_v52 }
 0x125   :  { %v2750_v30 = vpop.permute.xlu1 %428  ;;  %v2752_v55 = vpop.permute.xlu0 %430 }
 0x126   :  { %3727 = vst [vmem:[#allocation58_spill] sm:$0xff] %v2750_v30  ;;  %3728 = vst [vmem:[#allocation59_spill] sm:$0xff] %v2752_v55  ;;  %v523_v30 = vrot.slane %v2333_v41, 7 }
 0x129   :  { %v2754_v27 = vpop.permute.xlu1 %432  ;;  %v2756_v4 = vpop.permute.xlu0 %434 }
 0x12a   :  { %3729 = vst [vmem:[#allocation60_spill] sm:$0xff] %v2754_v27  ;;  %3730 = vst [vmem:[#allocation61_spill] sm:$0xff] %v2756_v4  ;;  %v3739_v4 = vrot.slane %v2321_v35, 7 }
 0x12d   :  { %v2758_v19 = vpop.permute.xlu1 %436  ;;  %v2760_v17 = vpop.permute.xlu0 %438 }
 0x12e   :  { %3731 = vst [vmem:[#allocation62_spill] sm:$0xff] %v2758_v19  ;;  %3732 = vst [vmem:[#allocation63_spill] sm:$0xff] %v2760_v17  ;;  %v524_v19 = vsel %vm237_vm0, %v3739_v4, %v523_v30  ;;  %v528_v4 = vrot.slane %v2346_v46, 7 }
 0x131   :  { %v2762_v14 = vpop.permute.xlu1 %440  ;;  %v2764_v3 = vpop.permute.xlu0 %442 }
 0x132   :  { %3733 = vst [vmem:[#allocation64_spill] sm:$0xff] %v2762_v14  ;;  %3734 = vst [vmem:[#allocation65_spill] sm:$0xff] %v2764_v3  ;;  %v609_v3 = vsub.f32 %v2333_v41, %v524_v19 }
 0x134   :  { %v1160_v28 = vand.u32 2147483647, %v609_v3 }
 0x135   :  { %v2766_v47 = vpop.permute.xlu1 %444  ;;  %v2768_v24 = vpop.permute.xlu0 %446 }
 0x136   :  { %3735 = vst [vmem:[#allocation66_spill] sm:$0xff] %v2766_v47  ;;  %3736 = vst [vmem:[#allocation67_spill] sm:$0xff] %v2768_v24  ;;  %v526_v47 = vrot.slane %v2343_v45, 7  ;;  %v525_v24 = vrot.slane %v2336_v42, 7 }
 0x138   :  { %v610_v3 = vsub.f32 %v2336_v42, %v525_v24 }
 0x139   :  { %v2771_v52 = vpop.permute.xlu1 %448  ;;  %v2773_v55 = vpop.permute.xlu0 %450 }
 0x13a   :  { %3737 = vst [vmem:[#allocation68_spill] sm:$0xff] %v2771_v52  ;;  %3738 = vst [vmem:[#allocation69_spill] sm:$0xff] %v2773_v55 }
 0x13d   :  { %v2778_v27 = vpop.permute.xlu1 %452  ;;  %v671_v17 = vpop.permute.xlu0 %670 }
 0x13e   :  { %3740 = vst [vmem:[#allocation70_spill] sm:$0xff] %v2778_v27  ;;  %v766_v14 = vsub.f32 %v2476_v37, %v671_v17  ;;  %v527_v17 = vsel %vm237_vm0, %v525_v24, %v526_v47  ;;  %v3741_v24 = vrot.slane %v2704_v60, 1  ;;  %v533_v60 = vrot.slane %v2363_v53, 7 }
 0x140   :  { %v1452_v48 = vand.u32 2147483647, %v766_v14 }
 0x141   :  { %v675_v43 = vpop.permute.xlu0 %674  ;;  %v673_v52 = vpop.permute.xlu1 %672 }
 0x142   :  { %v768_v55 = vsub.f32 %v2490_v1, %v675_v43  ;;  %v767_v21 = vsub.f32 %v2493_v39, %v673_v52  ;;  %v1516_v37 = vrot.slane %v1452_v48, 1  ;;  %v530_v43 = vrot.slane %v2353_v49, 7 }
 0x143   :  { %v1227_v1 = vrot.slane %v1160_v28, 1  ;;  %v611_v52 = vsub.f32 %v2343_v45, %v527_v17  ;;  %v529_v39 = vsel %vm237_vm0, %v526_v47, %v528_v4  ;;  %v1161_v17 = vand.u32 2147483647, %v610_v3 }
 0x144   :  { %v1454_v30 = vand.u32 2147483647, %v768_v55  ;;  %v1453_v27 = vand.u32 2147483647, %v767_v21 }
 0x145   :  { %v679_v19 = vpop.permute.xlu0 %678  ;;  %v677_v15 = vpop.permute.xlu1 %676  ;;  %v1229_v3 = vrot.slane %v1161_v17, 1 }
 0x146   :  { %v1519_v36 = vrot.slane %v1454_v30, 1  ;;  %v1517_v40 = vrot.slane %v1453_v27, 1  ;;  %v770_v14 = vsub.f32 %v2503_v63, %v679_v19  ;;  %v769_v51 = vsub.f32 %v2506_v0, %v677_v15 }
 0x147   :  { %v1162_v63 = vand.u32 2147483647, %v611_v52 }
 0x148   :  { %v1455_v55 = vand.u32 2147483647, %v769_v51  ;;  %v1520_v21 = vsel %vm1221_vm1, %v1517_v40, %v1519_v36  ;;  %v1518_v48 = vsel %vm1221_vm1, %v1516_v37, %v1517_v40  ;;  %v1456_v15 = vand.u32 2147483647, %v770_v14 }
 0x149   :  { %1574 = vrot.lane.b32.xlu1 %v1520_v21, %s2145_s0  ;;  %1572 = vrot.lane.b32.xlu0 %v1518_v48, %s2145_s0  ;;  %v681_v27 = vpop.permute.xlu1 %680  ;;  %v683_v19 = vpop.permute.xlu0 %682  ;;  %v1228_v51 = vsel %vm1221_vm1, %v3741_v24, %v1227_v1  ;;  %v612_v40 = vsub.f32 %v2346_v46, %v529_v39  ;;  %v531_v48 = vsel %vm237_vm0, %v528_v4, %v530_v43  ;;  %v1230_v52 = vrot.slane %v1162_v63, 1 }
 0x14a   :  { %v1521_v30 = vrot.slane %v1455_v55, 1  ;;  %v771_v28 = vsub.f32 %v2520_v2, %v681_v27  ;;  %v772_v37 = vsub.f32 %v2517_v5, %v683_v19  ;;  %v1523_v14 = vrot.slane %v1456_v15, 1 }
 0x14b   :  { %v613_v39 = vsub.f32 %v2353_v49, %v531_v48  ;;  %v532_v19 = vrot.slane %v2356_v50, 7  ;;  %v1163_v24 = vand.u32 2147483647, %v612_v40  ;;  %v1231_v43 = vsel %vm1221_vm1, %v1229_v3, %v1230_v52 }
 0x14c   :  { %v1457_v47 = vand.u32 2147483647, %v771_v28  ;;  %v1522_v21 = vsel %vm1221_vm1, %v1519_v36, %v1521_v30  ;;  %v1458_v28 = vand.u32 2147483647, %v772_v37 }
 0x14d   :  { %1282 = vrot.lane.b32.xlu1 %v1228_v51, %s2145_s0  ;;  %1576 = vrot.lane.b32.xlu0 %v1522_v21, %s2145_s0  ;;  %v685_v27 = vpop.permute.xlu1 %684  ;;  %v1164_v15 = vand.u32 2147483647, %v613_v39  ;;  %v1232_v63 = vrot.slane %v1163_v24, 1  ;;  %v687_v37 = vpop.permute.xlu0 %686  ;;  %v614_v40 = vsub.f32 %v2356_v50, %v532_v19 }
 0x14e   :  { %v1524_v55 = vrot.slane %v1457_v47, 1  ;;  %v773_v36 = vsub.f32 %v2533_v7, %v685_v27  ;;  %v1526_v51 = vrot.slane %v1458_v28, 1  ;;  %v534_v47 = vsel %vm237_vm0, %v532_v19, %v533_v60 }
 0x14f   :  { %v615_v48 = vsub.f32 %v2363_v53, %v534_v47  ;;  %v1233_v3 = vsel %vm1221_vm1, %v1230_v52, %v1232_v63  ;;  %v1234_v39 = vrot.slane %v1164_v15, 1  ;;  %v1165_v19 = vand.u32 2147483647, %v614_v40 }
 0x150   :  { %v1525_v4 = vsel %vm1221_vm1, %v1523_v14, %v1524_v55  ;;  %v1459_v17 = vand.u32 2147483647, %v773_v36  ;;  %v1527_v27 = vsel %vm1221_vm1, %v1524_v55, %v1526_v51  ;;  %v487_v47 = vsub.f32 %v2326_v38, %v2684_v20 }
 0x151   :  { %1578 = vrot.lane.b32.xlu1 %v1521_v30, %s2145_s0  ;;  %1284 = vrot.lane.b32.xlu0 %v1227_v1, %s2145_s0  ;;  %v689_v21 = vpop.permute.xlu1 %688  ;;  %v774_v1 = vsub.f32 %v2530_v59, %v687_v37  ;;  %v1235_v24 = vsel %vm1221_vm1, %v1232_v63, %v1234_v39  ;;  %v1236_v15 = vrot.slane %v1165_v19, 1  ;;  %v489_v40 = vsub.f32 %v2333_v41, %v2700_v12 }
 0x152   :  { %v775_v30 = vsub.f32 %v2547_v6, %v689_v21  ;;  %v1528_v14 = vrot.slane %v1459_v17, 1  ;;  %v491_v20 = vsub.f32 %v2343_v45, %v2713_v22 }
 0x153   :  { %v1460_v28 = vand.u32 2147483647, %v774_v1  ;;  %v920_v1 = vand.u32 2147483647, %v487_v47  ;;  %v922_v38 = vand.u32 2147483647, %v489_v40 }
 0x154   :  { %v2829_v36 = vand.u32 2147483647, %v775_v30  ;;  %v488_v30 = vsub.f32 %v2321_v35, %v2686_v25  ;;  %v537_v35 = vrot.slane %v2373_v57, 7  ;;  %v924_v12 = vand.u32 2147483647, %v491_v20 }
 0x155   :  { %1286 = vrot.lane.b32.xlu1 %v1231_v43, %s2145_s0  ;;  %1580 = vrot.lane.b32.xlu0 %v1525_v4, %s2145_s0  ;;  %v1529_v4 = vsel %vm1221_vm1, %v1526_v51, %v1528_v14  ;;  %v2833_v43 = vand.u32 2147483647, %v615_v48  ;;  %v1530_v55 = vrot.slane %v1460_v28, 1  ;;  %v486_v51 = vsub.f32 %v2318_v34, %v2664_v18  ;;  %v693_v28 = vpop.permute.xlu1 %692 }
 0x156   :  { %v1531_v52 = vrot.slane %v2829_v36, 1  ;;  %v535_v48 = vrot.slane %v2366_v54, 7  ;;  %v921_v34 = vand.u32 2147483647, %v488_v30  ;;  %v490_v18 = vsub.f32 %v2336_v42, %v2702_v23  ;;  %v691_v23 = vpop.permute.xlu0 %690 }
 0x157   :  { %v1237_v17 = vrot.slane %v2833_v43, 1  ;;  %v919_v21 = vand.u32 2147483647, %v486_v51  ;;  %v493_v42 = vsub.f32 %v2353_v49, %v2722_v32  ;;  %v776_v45 = vsub.f32 %v2544_v9, %v691_v23 }
 0x158   :  { %v1532_v63 = vsel %vm1221_vm1, %v1530_v55, %v1531_v52  ;;  %v536_v41 = vsel %vm237_vm0, %v533_v60, %v535_v48  ;;  %v923_v25 = vand.u32 2147483647, %v490_v18  ;;  %v777_v19 = vsub.f32 %v2560_v11, %v693_v28 }
 0x159   :  { %1582 = vrot.lane.b32.xlu1 %v1527_v27, %s2145_s0  ;;  %1288 = vrot.lane.b32.xlu0 %v1233_v3, %s2145_s0  ;;  %v1238_v37 = vsel %vm1221_vm1, %v1236_v15, %v1237_v17  ;;  %v616_v22 = vsub.f32 %v2366_v54, %v536_v41  ;;  %v538_v27 = vsel %vm237_vm0, %v535_v48, %v537_v35  ;;  %v926_v3 = vand.u32 2147483647, %v493_v42  ;;  %v697_v15 = vpop.permute.xlu1 %696 }
 0x15a   :  { %v1462_v49 = vand.u32 2147483647, %v776_v45  ;;  %v617_v32 = vsub.f32 %v2373_v57, %v538_v27  ;;  %v497_v30 = vsub.f32 %v2373_v57, %v2734_v16  ;;  %v779_v18 = vsub.f32 %v2574_v10, %v697_v15  ;;  %v3745_v15 = vld [vmem:[#allocation36_spill] sm:$0xff] }
 0x15b   :  { %v544_v41 = vrot.slane %v2393_v33, 7  ;;  %v498_v42 = vsub.f32 %v2376_v58, %v2736_v31 }
 0x15c   :  { %v1168_v55 = vand.u32 2147483647, %v617_v32  ;;  %v930_v57 = vand.u32 2147483647, %v497_v30 }
 0x15d   :  { %1290 = vrot.lane.b32.xlu1 %v1235_v24, %s2145_s0  ;;  %1584 = vrot.lane.b32.xlu0 %v1529_v4, %s2145_s0  ;;  %v1533_v4 = vrot.slane %v1462_v49, 1 }
 0x15f   :  { %v1534_v51 = vsel %vm1221_vm1, %v1531_v52, %v1533_v4 }
 0x161   :  { %1586 = vrot.lane.b32.xlu1 %v1528_v14, %s2145_s0  ;;  %1292 = vrot.lane.b32.xlu0 %v1234_v39, %s2145_s0  ;;  %v492_v14 = vsub.f32 %v2346_v46, %v2715_v56  ;;  %v494_v39 = vsub.f32 %v2356_v50, %v2724_v29  ;;  %v495_v46 = vsub.f32 %v2363_v53, %v2730_v26  ;;  %v1167_v56 = vand.u32 2147483647, %v616_v22  ;;  %v695_v26 = vpop.permute.xlu0 %694 }
 0x162   :  { %v540_v50 = vrot.slane %v2383_v61, 7  ;;  %v539_v53 = vrot.slane %v2376_v58, 7  ;;  %v496_v29 = vsub.f32 %v2366_v54, %v2732_v8 }
 0x163   :  { %v925_v60 = vand.u32 2147483647, %v492_v14  ;;  %v927_v36 = vand.u32 2147483647, %v494_v39  ;;  %v928_v24 = vand.u32 2147483647, %v495_v46 }
 0x164   :  { %v1239_v43 = vrot.slane %v1167_v56, 1  ;;  %v618_v8 = vsub.f32 %v2376_v58, %v539_v53  ;;  %v1465_v14 = vand.u32 2147483647, %v779_v18  ;;  %v931_v56 = vand.u32 2147483647, %v498_v42  ;;  %v3742_v58 = vld [vmem:[#allocation52_spill] sm:$0xff] }
 0x165   :  { %1294 = vrot.lane.b32.xlu1 %v1238_v37, %s2145_s0  ;;  %1588 = vrot.lane.b32.xlu0 %v1532_v63, %s2145_s0  ;;  %v1463_v63 = vand.u32 2147483647, %v777_v19  ;;  %v1241_v37 = vrot.slane %v1168_v55, 1  ;;  %v699_v48 = vpop.permute.xlu0 %698  ;;  %v499_v31 = vsub.f32 %v2383_v61, %v3742_v58  ;;  %v3743_v55 = vld [vmem:[#allocation16_spill] sm:$0xff] }
 0x166   :  { %v1240_v47 = vsel %vm1221_vm1, %v1237_v17, %v1239_v43  ;;  %v542_v17 = vrot.slane %v2386_v62, 7  ;;  %v1169_v20 = vand.u32 2147483647, %v618_v8  ;;  %v780_v22 = vsub.f32 %v2571_v13, %v699_v48 }
 0x167   :  { %v1535_v40 = vrot.slane %v1463_v63, 1  ;;  %v1242_v54 = vsel %vm1221_vm1, %v1239_v43, %v1241_v37  ;;  %v1538_v49 = vrot.slane %v1465_v14, 1 }
 0x168   :  { %v1243_v27 = vrot.slane %v1169_v20, 1  ;;  %v545_v39 = vsel %vm237_vm0, %v542_v17, %v544_v41  ;;  %v1466_v32 = vand.u32 2147483647, %v780_v22 }
 0x169   :  { %985 = vrot.lane.b32.xlu1 %v920_v1, %s2146_s30  ;;  %983 = vrot.lane.b32.xlu0 %v919_v21, %s2146_s30  ;;  %v541_v21 = vsel %vm237_vm0, %v539_v53, %v540_v50  ;;  %v929_v1 = vand.u32 2147483647, %v496_v29  ;;  %v1536_v16 = vsel %vm1221_vm1, %v1533_v4, %v1535_v40  ;;  %v2911_v23 = vpop.permute.xlu0 %702  ;;  %v3744_v53 = vld [vmem:[#allocation15_spill] sm:$0xff] }
 0x16a   :  { %v619_v52 = vsub.f32 %v2383_v61, %v541_v21  ;;  %v546_v29 = vrot.slane %v3744_v53, 7  ;;  %v932_v61 = vand.u32 2147483647, %v499_v31 }
 0x16c   :  { %v1170_v35 = vand.u32 2147483647, %v619_v52 }
 0x16d   :  { %989 = vrot.lane.b32.xlu1 %v922_v38, %s2146_s30  ;;  %987 = vrot.lane.b32.xlu0 %v921_v34, %s2146_s30  ;;  %v701_v34 = vpop.permute.xlu1 %700  ;;  %v778_v38 = vsub.f32 %v2557_v44, %v695_v26  ;;  %v707_v4 = vpop.permute.xlu0 %706  ;;  %v1540_v26 = vrot.slane %v1466_v32, 1 }
 0x16e   :  { %v781_v63 = vsub.f32 %v3745_v15, %v701_v34  ;;  %v3747_v34 = vld [vmem:[#allocation54_spill] sm:$0xff] }
 0x16f   :  { %v1541_v8 = vsel %vm1221_vm1, %v1538_v49, %v1540_v26 }
 0x171   :  { %993 = vrot.lane.b32.xlu1 %v924_v12, %s2146_s30  ;;  %991 = vrot.lane.b32.xlu0 %v923_v25, %s2146_s30  ;;  %v543_v25 = vsel %vm237_vm0, %v540_v50, %v542_v17  ;;  %v1464_v12 = vand.u32 2147483647, %v778_v38  ;;  %v2913_v45 = vpop.permute.xlu1 %704  ;;  %v547_v50 = vrot.slane %v3743_v55, 7  ;;  %v622_v38 = vsub.f32 %v3744_v53, %v546_v29 }
 0x173   :  { %v1537_v46 = vrot.slane %v1464_v12, 1  ;;  %v3749_v12 = vld [vmem:[#allocation18_spill] sm:$0xff]  ;;  %v1173_v42 = vand.u32 2147483647, %v622_v38  ;;  %v3757_v38 = vld [vmem:[#allocation40_spill] sm:$0xff] }
 0x174   :  { %v551_v14 = vrot.slane %v3749_v12, 7 }
 0x175   :  { %997 = vrot.lane.b32.xlu1 %v926_v3, %s2146_s30  ;;  %995 = vrot.lane.b32.xlu0 %v925_v60, %s2146_s30  ;;  %v1244_v60 = vrot.slane %v1170_v35, 1  ;;  %v620_v3 = vsub.f32 %v2386_v62, %v543_v25  ;;  %v2924_v19 = vpop.permute.xlu1 %708  ;;  %v1539_v43 = vsel %vm1221_vm1, %v1537_v46, %v1538_v49 }
 0x177   :  { %v1245_v28 = vsel %vm1221_vm1, %v1243_v27, %v1244_v60  ;;  %v3750_v27 = vld [vmem:[#allocation35_spill] sm:$0xff] }
 0x179   :  { %1001 = vrot.lane.b32.xlu1 %v928_v24, %s2146_s30  ;;  %999 = vrot.lane.b32.xlu0 %v927_v36, %s2146_s30  ;;  %v1171_v36 = vand.u32 2147483647, %v620_v3  ;;  %v621_v24 = vsub.f32 %v2393_v33, %v545_v39  ;;  %v2938_v30 = vpop.permute.xlu1 %712  ;;  %v3751_v3 = vld [vmem:[#allocation38_spill] sm:$0xff] }
 0x17a   :  { %v783_v39 = vsub.f32 %v3751_v3, %v2913_v45 }
 0x17d   :  { %1590 = vrot.lane.b32.xlu1 %v1534_v51, %s2145_s0  ;;  %1296 = vrot.lane.b32.xlu0 %v1240_v47, %s2145_s0  ;;  %v1246_v51 = vrot.slane %v1171_v36, 1  ;;  %v1172_v47 = vand.u32 2147483647, %v621_v24  ;;  %v2953_v25 = vpop.permute.xlu1 %716  ;;  %v3753_v24 = vld [vmem:[#allocation37_spill] sm:$0xff] }
 0x17f   :  { %v1247_v52 = vsel %vm1221_vm1, %v1244_v60, %v1246_v51  ;;  %v1248_v17 = vrot.slane %v1172_v47, 1  ;;  %v782_v60 = vsub.f32 %v3750_v27, %v2911_v23 }
 0x181   :  { %1298 = vrot.lane.b32.xlu1 %v1242_v54, %s2145_s0  ;;  %1003 = vrot.lane.b32.xlu0 %v929_v1, %s2146_s30  ;;  %v2936_v1 = vpop.permute.xlu0 %710  ;;  %v1467_v54 = vand.u32 2147483647, %v781_v63  ;;  %v1249_v35 = vsel %vm1221_vm1, %v1246_v51, %v1248_v17  ;;  %v2970_v32 = vpop.permute.xlu1 %720  ;;  %v1468_v45 = vand.u32 2147483647, %v782_v60 }
 0x183   :  { %v1542_v20 = vrot.slane %v1467_v54, 1  ;;  %v1544_v47 = vrot.slane %v1468_v45, 1 }
 0x185   :  { %1005 = vrot.lane.b32.xlu1 %v930_v57, %s2146_s30  ;;  %1592 = vrot.lane.b32.xlu0 %v1536_v16, %s2145_s0  ;;  %v3748_v57 = vld [vmem:[#allocation17_spill] sm:$0xff]  ;;  %v2951_v41 = vpop.permute.xlu0 %714  ;;  %v1543_v46 = vsel %vm1221_vm1, %v1540_v26, %v1542_v20  ;;  %v2983_v54 = vpop.permute.xlu1 %724 }
 0x186   :  { %v549_v16 = vrot.slane %v3748_v57, 7 }
 0x188   :  { %v550_v49 = vsel %vm237_vm0, %v547_v50, %v549_v16 }
 0x189   :  { %1594 = vrot.lane.b32.xlu1 %v1535_v40, %s2145_s0  ;;  %1300 = vrot.lane.b32.xlu0 %v1241_v37, %s2145_s0  ;;  %v3746_v37 = vld [vmem:[#allocation53_spill] sm:$0xff]  ;;  %v548_v40 = vsel %vm237_vm0, %v546_v29, %v547_v50  ;;  %v2968_v31 = vpop.permute.xlu0 %718  ;;  %v624_v36 = vsub.f32 %v3748_v57, %v550_v49  ;;  %v1469_v29 = vand.u32 2147483647, %v783_v39  ;;  %v552_v50 = vsel %vm237_vm0, %v549_v16, %v551_v14 }
 0x18a   :  { %v500_v21 = vsub.f32 %v2386_v62, %v3746_v37  ;;  %v501_v62 = vsub.f32 %v2393_v33, %v3747_v34  ;;  %v623_v18 = vsub.f32 %v3743_v55, %v548_v40  ;;  %v625_v51 = vsub.f32 %v3749_v12, %v552_v50 }
 0x18b   :  { %v1175_v40 = vand.u32 2147483647, %v624_v36  ;;  %v3760_v36 = vld [vmem:[#allocation58_spill] sm:$0xff] }
 0x18c   :  { %v933_v48 = vand.u32 2147483647, %v500_v21  ;;  %v934_v33 = vand.u32 2147483647, %v501_v62  ;;  %v1174_v22 = vand.u32 2147483647, %v623_v18  ;;  %v785_v18 = vsub.f32 %v3757_v38, %v2924_v19 }
 0x18d   :  { %1302 = vrot.lane.b32.xlu1 %v1245_v28, %s2145_s0  ;;  %1007 = vrot.lane.b32.xlu0 %v931_v56, %s2146_s30  ;;  %v3752_v56 = vld [vmem:[#allocation55_spill] sm:$0xff]  ;;  %v1250_v28 = vrot.slane %v1173_v42, 1  ;;  %v1545_v21 = vrot.slane %v1469_v29, 1  ;;  %v1176_v34 = vand.u32 2147483647, %v625_v51  ;;  %v2998_v42 = vpop.permute.xlu1 %728  ;;  %v505_v45 = vsub.f32 %v3749_v12, %v3760_v36 }
 0x18e   :  { %v502_v58 = vsub.f32 %v3744_v53, %v3752_v56  ;;  %v1251_v23 = vrot.slane %v1174_v22, 1  ;;  %v3754_v53 = vld [vmem:[#allocation56_spill] sm:$0xff]  ;;  %v1471_v60 = vand.u32 2147483647, %v785_v18  ;;  %v3759_v56 = vld [vmem:[#allocation21_spill] sm:$0xff] }
 0x18f   :  { %v503_v26 = vsub.f32 %v3743_v55, %v3754_v53  ;;  %v1546_v16 = vsel %vm1221_vm1, %v1544_v47, %v1545_v21  ;;  %v938_v51 = vand.u32 2147483647, %v505_v45  ;;  %v3762_v47 = vld [vmem:[#allocation39_spill] sm:$0xff] }
 0x190   :  { %v1252_v63 = vsel %vm1221_vm1, %v1250_v28, %v1251_v23 }
 0x191   :  { %1009 = vrot.lane.b32.xlu1 %v932_v61, %s2146_s30  ;;  %1596 = vrot.lane.b32.xlu0 %v1539_v43, %s2145_s0  ;;  %v784_v43 = vsub.f32 %v3753_v24, %v707_v4  ;;  %v935_v61 = vand.u32 2147483647, %v502_v58  ;;  %v2981_v4 = vpop.permute.xlu0 %722  ;;  %v556_v58 = vrot.slane %v3759_v56, 7 }
 0x193   :  { %v1470_v37 = vand.u32 2147483647, %v784_v43  ;;  %v1549_v43 = vrot.slane %v1471_v60, 1 }
 0x195   :  { %1598 = vrot.lane.b32.xlu1 %v1541_v8, %s2145_s0  ;;  %1304 = vrot.lane.b32.xlu0 %v1247_v52, %s2145_s0  ;;  %v3755_v8 = vld [vmem:[#allocation20_spill] sm:$0xff]  ;;  %v1547_v62 = vrot.slane %v1470_v37, 1  ;;  %v786_v37 = vsub.f32 %v3762_v47, %v2936_v1  ;;  %v3765_v1 = vld [vmem:[#allocation41_spill] sm:$0xff] }
 0x196   :  { %v554_v52 = vrot.slane %v3755_v8, 7 }
 0x197   :  { %v1548_v39 = vsel %vm1221_vm1, %v1545_v21, %v1547_v62  ;;  %v3763_v21 = vld [vmem:[#allocation42_spill] sm:$0xff] }
 0x198   :  { %v557_v12 = vsel %vm237_vm0, %v554_v52, %v556_v58 }
 0x199   :  { %1306 = vrot.lane.b32.xlu1 %v1249_v35, %s2145_s0  ;;  %1011 = vrot.lane.b32.xlu0 %v933_v48, %s2146_s30  ;;  %v936_v48 = vand.u32 2147483647, %v503_v26  ;;  %v3758_v35 = vld [vmem:[#allocation57_spill] sm:$0xff]  ;;  %v3761_v26 = vld [vmem:[#allocation22_spill] sm:$0xff]  ;;  %v628_v18 = vsub.f32 %v3759_v56, %v557_v12 }
 0x19a   :  { %v504_v14 = vsub.f32 %v3748_v57, %v3758_v35  ;;  %v1472_v35 = vand.u32 2147483647, %v786_v37 }
 0x19c   :  { %v937_v28 = vand.u32 2147483647, %v504_v14 }
 0x19d   :  { %1013 = vrot.lane.b32.xlu1 %v934_v33, %s2146_s30  ;;  %1600 = vrot.lane.b32.xlu0 %v1543_v46, %s2145_s0  ;;  %v2996_v33 = vpop.permute.xlu0 %726  ;;  %v1255_v46 = vrot.slane %v1176_v34, 1 }
 0x1a1   :  { %1602 = vrot.lane.b32.xlu1 %v1542_v20, %s2145_s0  ;;  %1308 = vrot.lane.b32.xlu0 %v1248_v17, %s2145_s0  ;;  %v3756_v17 = vld [vmem:[#allocation19_spill] sm:$0xff]  ;;  %v1253_v20 = vrot.slane %v1175_v40, 1  ;;  %v3011_v50 = vpop.permute.xlu0 %730  ;;  %v787_v40 = vsub.f32 %v3763_v21, %v2938_v30 }
 0x1a2   :  { %v553_v55 = vrot.slane %v3756_v17, 7 }
 0x1a3   :  { %v1254_v19 = vsel %vm1221_vm1, %v1251_v23, %v1253_v20  ;;  %v1256_v29 = vsel %vm1221_vm1, %v1253_v20, %v1255_v46  ;;  %v3013_v23 = vpop.permute.xlu1 %732 }
 0x1a4   :  { %v555_v22 = vsel %vm237_vm0, %v553_v55, %v554_v52  ;;  %v626_v49 = vsub.f32 %v3756_v17, %v553_v55  ;;  %v1550_v55 = vsel %vm1221_vm1, %v1547_v62, %v1549_v43  ;;  %v788_v52 = vsub.f32 %v3765_v1, %v2951_v41 }
 0x1a5   :  { %1310 = vrot.lane.b32.xlu1 %v1252_v63, %s2145_s0  ;;  %1015 = vrot.lane.b32.xlu0 %v935_v61, %s2146_s30  ;;  %v627_v57 = vsub.f32 %v3755_v8, %v555_v22  ;;  %v558_v63 = vrot.slane %v3761_v26, 7  ;;  %v1279_v14 = vpop.permute.xlu0 %1278  ;;  %v1473_v62 = vand.u32 2147483647, %v787_v40  ;;  %v1551_v41 = vrot.slane %v1472_v35, 1  ;;  %v3769_v35 = vld [vmem:[#allocation44_spill] sm:$0xff] }
 0x1a6   :  { %v1177_v61 = vand.u32 2147483647, %v626_v49  ;;  %v3766_v49 = vld [vmem:[#allocation60_spill] sm:$0xff] }
 0x1a7   :  { %v1178_v53 = vand.u32 2147483647, %v627_v57  ;;  %v1281_v22 = vpop.permute.xlu1 %1280  ;;  %v559_v30 = vsel %vm237_vm0, %v556_v58, %v558_v63  ;;  %v507_v57 = vsub.f32 %v3755_v8, %v3766_v49  ;;  %v1552_v45 = vrot.slane %v1473_v62, 1  ;;  %v3768_v63 = vld [vmem:[#allocation23_spill] sm:$0xff] }
 0x1a8   :  { %v560_v8 = vrot.slane %v3768_v63, 7 }
 0x1a9   :  { %1017 = vrot.lane.b32.xlu1 %v936_v48, %s2146_s30  ;;  %1604 = vrot.lane.b32.xlu0 %v1546_v16, %s2145_s0  ;;  %v1257_v48 = vrot.slane %v1177_v61, 1  ;;  %v1258_v34 = vrot.slane %v1178_v53, 1  ;;  %v3764_v16 = vld [vmem:[#allocation59_spill] sm:$0xff]  ;;  %v3767_v61 = vld [vmem:[#allocation24_spill] sm:$0xff]  ;;  %v940_v40 = vand.u32 2147483647, %v507_v57  ;;  %v1553_v62 = vsel %vm1221_vm1, %v1551_v41, %v1552_v45 }
 0x1aa   :  { %v506_v20 = vsub.f32 %v3756_v17, %v3764_v16  ;;  %v561_v53 = vrot.slane %v3767_v61, 7 }
 0x1ab   :  { %v1259_v60 = vsel %vm1221_vm1, %v1257_v48, %v1258_v34 }
 0x1ac   :  { %v939_v17 = vand.u32 2147483647, %v506_v20 }
 0x1ad   :  { %1606 = vrot.lane.b32.xlu1 %v1548_v39, %s2145_s0  ;;  %1312 = vrot.lane.b32.xlu0 %v1254_v19, %s2145_s0  ;;  %v1179_v39 = vand.u32 2147483647, %v628_v18  ;;  %v629_v19 = vsub.f32 %v3761_v26, %v559_v30 }
 0x1af   :  { %v1260_v37 = vrot.slane %v1179_v39, 1  ;;  %v3048_v12 = vand.u32 2147483647, %v629_v19  ;;  %v3770_v39 = vld [vmem:[#allocation61_spill] sm:$0xff] }
 0x1b0   :  { %v508_v19 = vsub.f32 %v3759_v56, %v3770_v39  ;;  %v630_v56 = vsub.f32 %v3768_v63, %v560_v8  ;;  %v3773_v39 = vld [vmem:[#allocation26_spill] sm:$0xff] }
 0x1b1   :  { %1314 = vrot.lane.b32.xlu1 %v1256_v29, %s2145_s0  ;;  %1019 = vrot.lane.b32.xlu0 %v937_v28, %s2146_s30  ;;  %v3038_v28 = vand.u32 2147483647, %v788_v52  ;;  %v789_v52 = vsub.f32 %v3769_v35, %v2953_v25  ;;  %v1261_v25 = vsel %vm1221_vm1, %v1258_v34, %v1260_v37  ;;  %v1262_v57 = vrot.slane %v3048_v12, 1 }
 0x1b5   :  { %1021 = vrot.lane.b32.xlu1 %v938_v51, %s2146_s30  ;;  %1608 = vrot.lane.b32.xlu0 %v1550_v55, %s2145_s0  ;;  %v1375_v51 = vsel %vm1374_vm2, %v1279_v14, 0.0  ;;  %v1554_v55 = vrot.slane %v3038_v28, 1  ;;  %v562_v28 = vsel %vm237_vm0, %v560_v8, %v561_v53  ;;  %v1181_v8 = vand.u32 2147483647, %v630_v56 }
 0x1b6   :  { %v631_v34 = vsub.f32 %v3767_v61, %v562_v28 }
 0x1b9   :  { %1610 = vrot.lane.b32.xlu1 %v1549_v43, %s2145_s0  ;;  %1316 = vrot.lane.b32.xlu0 %v1255_v46, %s2145_s0  ;;  %v1376_v43 = vsel %vm1374_vm2, %v1281_v22, 0.0 }
 0x1ba   :  { %v1377_v48 = vadd.f32 %v1376_v43, %v1375_v51  ;;  %v1555_v43 = vsel %vm1221_vm1, %v1552_v45, %v1554_v55  ;;  %v3771_v51 = vld [vmem:[#allocation25_spill] sm:$0xff] }
 0x1bb   :  { %v1573_v36 = vpop.permute.xlu0 %1572  ;;  %v1575_v58 = vpop.permute.xlu1 %1574  ;;  %v563_v12 = vrot.slane %v3771_v51, 7 }
 0x1bc   :  { %v1668_v46 = vsel %vm1374_vm2, %v1573_v36, 0.0  ;;  %v1669_v29 = vsel %vm1374_vm2, %v1575_v58, 0.0  ;;  %v1475_v36 = vand.u32 2147483647, %v789_v52 }
 0x1bd   :  { %1318 = vrot.lane.b32.xlu1 %v1259_v60, %s2145_s0  ;;  %1023 = vrot.lane.b32.xlu0 %v939_v17, %s2146_s30  ;;  %v1670_v18 = vadd.f32 %v1669_v29, %v1668_v46 }
 0x1be   :  { %v1556_v52 = vrot.slane %v1475_v36, 1  ;;  %v564_v36 = vsel %vm237_vm0, %v561_v53, %v563_v12 }
 0x1bf   :  { %v1577_v16 = vpop.permute.xlu0 %1576  ;;  %v1283_v20 = vpop.permute.xlu1 %1282 }
 0x1c0   :  { %v1671_v22 = vsel %vm1374_vm2, %v1577_v16, 0.0  ;;  %v1378_v30 = vsel %vm1374_vm2, %v1283_v20, 0.0 }
 0x1c1   :  { %v1672_v14 = vadd.f32 %v1671_v22, %v1670_v18  ;;  %v1379_v60 = vadd.f32 %v1378_v30, %v1377_v48  ;;  %1025 = vrot.lane.b32.xlu1 %v940_v40, %s2146_s30  ;;  %1612 = vrot.lane.b32.xlu0 %v1553_v62, %s2145_s0  ;;  %v941_v40 = vand.u32 2147483647, %v508_v19  ;;  %v3772_v48 = vld [vmem:[#allocation62_spill] sm:$0xff]  ;;  %v1263_v30 = vsel %vm1221_vm1, %v1260_v37, %v1262_v57 }
 0x1c2   :  { %v509_v18 = vsub.f32 %v3761_v26, %v3772_v48  ;;  %v565_v26 = vrot.slane %v3773_v39, 7  ;;  %v3775_v37 = vld [vmem:[#allocation46_spill] sm:$0xff] }
 0x1c3   :  { %v1285_v17 = vpop.permute.xlu0 %1284  ;;  %v1579_v49 = vpop.permute.xlu1 %1578 }
 0x1c4   :  { %v1381_v41 = vsel %vm1380_vm3, %v1285_v17, 0.0  ;;  %v1673_v58 = vsel %vm1380_vm3, %v1579_v49, 0.0  ;;  %v942_v19 = vand.u32 2147483647, %v509_v18  ;;  %v3774_v17 = vld [vmem:[#allocation43_spill] sm:$0xff] }
 0x1c5   :  { %v1382_v46 = vadd.f32 %v1381_v41, %v1379_v60  ;;  %v1674_v29 = vadd.f32 %v1673_v58, %v1672_v14  ;;  %1614 = vrot.lane.b32.xlu1 %v1555_v43, %s2145_s0  ;;  %1320 = vrot.lane.b32.xlu0 %v1261_v25, %s2145_s0  ;;  %v3078_v60 = vand.u32 2147483647, %v631_v34  ;;  %v790_v49 = vsub.f32 %v3774_v17, %v2968_v31 }
 0x1c6   :  { %v791_v41 = vsub.f32 %v3775_v37, %v2970_v32  ;;  %v1264_v31 = vrot.slane %v1181_v8, 1  ;;  %v3777_v32 = vld [vmem:[#allocation45_spill] sm:$0xff] }
 0x1c7   :  { %v1581_v16 = vpop.permute.xlu0 %1580  ;;  %v1287_v20 = vpop.permute.xlu1 %1286  ;;  %v1265_v34 = vrot.slane %v3078_v60, 1  ;;  %v792_v48 = vsub.f32 %v3777_v32, %v2981_v4 }
 0x1c8   :  { %v1675_v45 = vsel %vm1374_vm2, %v1581_v16, 0.0  ;;  %v1383_v22 = vsel %vm1374_vm2, %v1287_v20, 0.0  ;;  %v632_v20 = vsub.f32 %v3771_v51, %v564_v36 }
 0x1c9   :  { %v1676_v62 = vadd.f32 %v1675_v45, %v1674_v29  ;;  %v1384_v14 = vadd.f32 %v1383_v22, %v1382_v46  ;;  %1322 = vrot.lane.b32.xlu1 %v1263_v30, %s2145_s0  ;;  %1027 = vrot.lane.b32.xlu0 %v941_v40, %s2146_s30  ;;  %v1557_v46 = vsel %vm1221_vm1, %v1554_v55, %v1556_v52  ;;  %v3776_v40 = vld [vmem:[#allocation63_spill] sm:$0xff]  ;;  %v1476_v45 = vand.u32 2147483647, %v790_v49 }
 0x1ca   :  { %v510_v53 = vsub.f32 %v3768_v63, %v3776_v40  ;;  %v566_v55 = vsel %vm237_vm0, %v563_v12, %v565_v26  ;;  %v1477_v22 = vand.u32 2147483647, %v791_v41  ;;  %v1266_v4 = vsel %vm1221_vm1, %v1264_v31, %v1265_v34 }
 0x1cb   :  { %v1289_v25 = vpop.permute.xlu0 %1288  ;;  %v1583_v28 = vpop.permute.xlu1 %1582  ;;  %v633_v63 = vsub.f32 %v3773_v39, %v566_v55  ;;  %v3106_v26 = vand.u32 2147483647, %v792_v48  ;;  %v1558_v36 = vrot.slane %v1476_v45, 1 }
 0x1cc   :  { %v1385_v58 = vsel %vm1374_vm2, %v1289_v25, 0.0  ;;  %v1677_v43 = vsel %vm1374_vm2, %v1583_v28, 0.0  ;;  %v943_v60 = vand.u32 2147483647, %v510_v53  ;;  %v1183_v28 = vand.u32 2147483647, %v632_v20 }
 0x1cd   :  { %v1386_v29 = vadd.f32 %v1385_v58, %v1384_v14  ;;  %v1678_v56 = vadd.f32 %v1677_v43, %v1676_v62  ;;  %1029 = vrot.lane.b32.xlu1 %v942_v19, %s2146_s30  ;;  %1616 = vrot.lane.b32.xlu0 %v1557_v46, %s2145_s0  ;;  %v3778_v19 = vld [vmem:[#allocation64_spill] sm:$0xff]  ;;  %v1559_v41 = vrot.slane %v1477_v22, 1  ;;  %v1561_v40 = vrot.slane %v3106_v26, 1 }
 0x1ce   :  { %v511_v12 = vsub.f32 %v3767_v61, %v3778_v19  ;;  %v3779_v46 = vld [vmem:[#allocation28_spill] sm:$0xff]  ;;  %v3780_v61 = vld [vmem:[#allocation27_spill] sm:$0xff] }
 0x1cf   :  { %v1585_v18 = vpop.permute.xlu0 %1584  ;;  %v1291_v16 = vpop.permute.xlu1 %1290  ;;  %v3781_v20 = vld [vmem:[#allocation48_spill] sm:$0xff] }
 0x1d0   :  { %v1679_v30 = vsel %vm1374_vm2, %v1585_v18, 0.0  ;;  %v1387_v62 = vsel %vm1374_vm2, %v1291_v16, 0.0  ;;  %v944_v31 = vand.u32 2147483647, %v511_v12  ;;  %v1267_v18 = vrot.slane %v1183_v28, 1 }
 0x1d1   :  { %v1680_v14 = vadd.f32 %v1679_v30, %v1678_v56  ;;  %v1388_v8 = vadd.f32 %v1387_v62, %v1386_v29  ;;  %1618 = vrot.lane.b32.xlu1 %v1556_v52, %s2145_s0  ;;  %1324 = vrot.lane.b32.xlu0 %v1262_v57, %s2145_s0  ;;  %v568_v29 = vrot.slane %v3779_v46, 7  ;;  %v567_v56 = vrot.slane %v3780_v61, 7 }
 0x1d2   :  { %v3115_v16 = vand.u32 2147483647, %v633_v63  ;;  %v793_v55 = vsub.f32 %v3781_v20, %v2983_v54  ;;  %v1560_v30 = vsel %vm1221_vm1, %v1558_v36, %v1559_v41  ;;  %v1562_v28 = vsel %vm1221_vm1, %v1559_v41, %v1561_v40 }
 0x1d3   :  { %v1293_v49 = vpop.permute.xlu0 %1292  ;;  %v1587_v25 = vpop.permute.xlu1 %1586  ;;  %v569_v12 = vsel %vm237_vm0, %v567_v56, %v568_v29 }
 0x1d4   :  { %v1389_v58 = vsel %vm1380_vm3, %v1293_v49, 0.0  ;;  %v1681_v52 = vsel %vm1380_vm3, %v1587_v25, 0.0  ;;  %v1269_v19 = vrot.slane %v3115_v16, 1  ;;  %v1479_v26 = vand.u32 2147483647, %v793_v55 }
 0x1d5   :  { %v1390_v57 = vadd.f32 %v1389_v58, %v1388_v8  ;;  %v1682_v43 = vadd.f32 %v1681_v52, %v1680_v14  ;;  %1326 = vrot.lane.b32.xlu1 %v1266_v4, %s2145_s0  ;;  %1031 = vrot.lane.b32.xlu0 %v943_v60, %s2146_s30  ;;  %v3782_v8 = vld [vmem:[#allocation65_spill] sm:$0xff]  ;;  %v1268_v60 = vsel %vm1221_vm1, %v1265_v34, %v1267_v18 }
 0x1d6   :  { %v512_v4 = vsub.f32 %v3771_v51, %v3782_v8  ;;  %v634_v51 = vsub.f32 %v3780_v61, %v567_v56  ;;  %v3783_v58 = vld [vmem:[#allocation29_spill] sm:$0xff]  ;;  %v1563_v16 = vrot.slane %v1479_v26, 1  ;;  %v1270_v55 = vsel %vm1221_vm1, %v1267_v18, %v1269_v19  ;;  %v3785_v56 = vld [vmem:[#allocation31_spill] sm:$0xff] }
 0x1d7   :  { %v1589_v53 = vpop.permute.xlu0 %1588  ;;  %v1295_v48 = vpop.permute.xlu1 %1294  ;;  %v570_v34 = vrot.slane %v3783_v58, 7  ;;  %v3786_v18 = vld [vmem:[#allocation47_spill] sm:$0xff] }
 0x1d8   :  { %v1683_v45 = vsel %vm1374_vm2, %v1589_v53, 0.0  ;;  %v1391_v22 = vsel %vm1374_vm2, %v1295_v48, 0.0  ;;  %v945_v52 = vand.u32 2147483647, %v512_v4  ;;  %v635_v48 = vsub.f32 %v3779_v46, %v569_v12 }
 0x1d9   :  { %v3122_v62 = vadd.f32 %v1683_v45, %v1682_v43  ;;  %v3124_v14 = vadd.f32 %v1391_v22, %v1390_v57  ;;  %1033 = vrot.lane.b32.xlu1 %v944_v31, %s2146_s30  ;;  %1620 = vrot.lane.b32.xlu0 %v1560_v30, %s2145_s0  ;;  %v3784_v57 = vld [vmem:[#allocation66_spill] sm:$0xff]  ;;  %v572_v22 = vrot.slane %v3785_v56, 7  ;;  %v1185_v8 = vand.u32 2147483647, %v634_v51 }
 0x1da   :  { %v513_v43 = vsub.f32 %v3773_v39, %v3784_v57  ;;  %v571_v12 = vsel %vm237_vm0, %v568_v29, %v570_v34  ;;  %v794_v26 = vsub.f32 %v3786_v18, %v2996_v33 }
 0x1db   :  { %v984_v63 = vpop.permute.xlu0 %983  ;;  %v986_v54 = vpop.permute.xlu1 %985  ;;  %v636_v57 = vsub.f32 %v3783_v58, %v571_v12  ;;  %v573_v29 = vsel %vm237_vm0, %v570_v34, %v572_v22 }
 0x1dc   :  { %v1080_v49 = vsel %vm1079_vm4, %v984_v63, 0.0  ;;  %v1081_v25 = vsel %vm1079_vm4, %v986_v54, 0.0  ;;  %v946_v39 = vand.u32 2147483647, %v513_v43  ;;  %v3788_v43 = vld [vmem:[#allocation67_spill] sm:$0xff] }
 0x1dd   :  { %v1082_v36 = vadd.f32 %v1081_v25, %v1080_v49  ;;  %1622 = vrot.lane.b32.xlu1 %v1562_v28, %s2145_s0  ;;  %1328 = vrot.lane.b32.xlu0 %v1268_v60, %s2145_s0  ;;  %v3149_v60 = vand.u32 2147483647, %v635_v48  ;;  %v3787_v49 = vld [vmem:[#allocation50_spill] sm:$0xff]  ;;  %v514_v33 = vsub.f32 %v3780_v61, %v3788_v43 }
 0x1de   :  { %v795_v25 = vsub.f32 %v3787_v49, %v2998_v42  ;;  %v3789_v42 = vld [vmem:[#allocation49_spill] sm:$0xff] }
 0x1df   :  { %v988_v31 = vpop.permute.xlu0 %987  ;;  %v990_v53 = vpop.permute.xlu1 %989 }
 0x1e0   :  { %v1083_v41 = vsel %vm1079_vm4, %v988_v31, 0.0  ;;  %v1085_v30 = vsel %vm1079_vm4, %v990_v53, 0.0  ;;  %v796_v31 = vsub.f32 %v3789_v42, %v3011_v50  ;;  %v3792_v50 = vld [vmem:[#allocation32_spill] sm:$0xff] }
 0x1e1   :  { %v1084_v45 = vadd.f32 %v1083_v41, %v1082_v36  ;;  %1330 = vrot.lane.b32.xlu1 %v1270_v55, %s2145_s0  ;;  %1035 = vrot.lane.b32.xlu0 %v945_v52, %s2146_s30  ;;  %v1564_v36 = vsel %vm1221_vm1, %v1561_v40, %v1563_v16  ;;  %v1271_v41 = vrot.slane %v1185_v8, 1  ;;  %v1480_v55 = vand.u32 2147483647, %v794_v26 }
 0x1e2   :  { %v801_v61 = vrot.slane %v3792_v50, 7  ;;  %v3175_v8 = vand.u32 2147483647, %v636_v57  ;;  %v637_v26 = vsub.f32 %v3785_v56, %v573_v29  ;;  %v803_v29 = vrot.slane %v2506_v0, 7 }
 0x1e3   :  { %v1086_v4 = vadd.f32 %v1085_v30, %v1084_v45  ;;  %v992_v63 = vpop.permute.xlu0 %991  ;;  %v994_v54 = vpop.permute.xlu1 %993  ;;  %v1481_v45 = vand.u32 2147483647, %v795_v25  ;;  %v947_v25 = vand.u32 2147483647, %v514_v33 }
 0x1e4   :  { %v1087_v28 = vsel %vm1079_vm4, %v992_v63, 0.0  ;;  %v1089_v51 = vsel %vm1079_vm4, %v994_v54, 0.0  ;;  %v3791_v54 = vld [vmem:[#allocation33_spill] sm:$0xff] }
 0x1e5   :  { %v1088_v52 = vadd.f32 %v1087_v28, %v1086_v4  ;;  %1037 = vrot.lane.b32.xlu1 %v946_v39, %s2146_s30  ;;  %1624 = vrot.lane.b32.xlu0 %v1564_v36, %s2145_s0  ;;  %v1272_v39 = vrot.slane %v3149_v60, 1  ;;  %v3790_v4 = vld [vmem:[#allocation30_spill] sm:$0xff]  ;;  %v799_v34 = vrot.slane %v3791_v54, 7  ;;  %v3793_v28 = vld [vmem:[#allocation68_spill] sm:$0xff]  ;;  %v3180_v36 = vand.u32 2147483647, %v796_v31 }
 0x1e6   :  { %v798_v63 = vrot.slane %v3790_v4, 7  ;;  %v515_v60 = vsub.f32 %v3779_v46, %v3793_v28  ;;  %v3190_v31 = vand.u32 2147483647, %v637_v26  ;;  %v3794_v28 = vld [vmem:[#allocation51_spill] sm:$0xff] }
 0x1e7   :  { %v1090_v53 = vadd.f32 %v1089_v51, %v1088_v52  ;;  %v996_v48 = vpop.permute.xlu0 %995  ;;  %v998_v40 = vpop.permute.xlu1 %997  ;;  %v802_v46 = vsel %vm237_vm0, %v799_v34, %v801_v61 }
 0x1e8   :  { %v1091_v30 = vsel %vm1079_vm4, %v996_v48, 0.0  ;;  %v1093_v12 = vsel %vm1079_vm4, %v998_v40, 0.0  ;;  %v1273_v48 = vsel %vm1221_vm1, %v1271_v41, %v1272_v39  ;;  %v800_v57 = vsel %vm237_vm0, %v798_v63, %v799_v34 }
 0x1e9   :  { %v1092_v22 = vadd.f32 %v1091_v30, %v1090_v53  ;;  %1626 = vrot.lane.b32.xlu1 %v1563_v16, %s2145_s0  ;;  %1332 = vrot.lane.b32.xlu0 %v1269_v19, %s2145_s0  ;;  %v1565_v16 = vrot.slane %v1480_v55, 1  ;;  %v1566_v53 = vrot.slane %v1481_v45, 1  ;;  %v948_v55 = vand.u32 2147483647, %v515_v60 }
 0x1ea   :  { %v1568_v45 = vrot.slane %v3180_v36, 1  ;;  %v886_v36 = vsub.f32 %v3790_v4, %v798_v63 }
 0x1eb   :  { %v1094_v52 = vadd.f32 %v1093_v12, %v1092_v22  ;;  %v1000_v51 = vpop.permute.xlu0 %999  ;;  %v1002_v43 = vpop.permute.xlu1 %1001  ;;  %v1274_v12 = vrot.slane %v3175_v8, 1  ;;  %v887_v8 = vsub.f32 %v3791_v54, %v800_v57 }
 0x1ec   :  { %v1095_v19 = vsel %vm1079_vm4, %v1000_v51, 0.0  ;;  %v1097_v33 = vsel %vm1079_vm4, %v1002_v43, 0.0  ;;  %v1567_v51 = vsel %vm1221_vm1, %v1565_v16, %v1566_v53  ;;  %v804_v43 = vsel %vm237_vm0, %v801_v61, %v803_v29 }
 0x1ed   :  { %v1096_v40 = vadd.f32 %v1095_v19, %v1094_v52  ;;  %1334 = vrot.lane.b32.xlu1 %v1273_v48, %s2145_s0  ;;  %1039 = vrot.lane.b32.xlu0 %v947_v25, %s2146_s30  ;;  %v797_v52 = vsub.f32 %v3794_v28, %v3013_v23  ;;  %v888_v23 = vsub.f32 %v3792_v50, %v802_v46  ;;  %v3795_v19 = vld [vmem:[#allocation69_spill] sm:$0xff]  ;;  %v1745_v61 = vand.u32 2147483647, %v887_v8  ;;  %v3796_v46 = vld [vmem:[#allocation34_spill] sm:$0xff] }
 0x1ee   :  { %v516_v48 = vsub.f32 %v3783_v58, %v3795_v19  ;;  %v1569_v63 = vsel %vm1221_vm1, %v1566_v53, %v1568_v45  ;;  %v1744_v58 = vand.u32 2147483647, %v886_v36  ;;  %v805_v29 = vrot.slane %v3796_v46, 7 }
 0x1ef   :  { %v1098_v30 = vadd.f32 %v1097_v33, %v1096_v40  ;;  %v1297_v41 = vpop.permute.xlu0 %1296  ;;  %v1591_v22 = vpop.permute.xlu1 %1590  ;;  %v1483_v33 = vand.u32 2147483647, %v797_v52  ;;  %v1746_v57 = vand.u32 2147483647, %v888_v23  ;;  %v1810_v23 = vrot.slane %v1745_v61, 2 }
 0x1f0   :  { %v1393_v25 = vsel %vm1374_vm2, %v1297_v41, 0.0  ;;  %v1685_v34 = vsel %vm1374_vm2, %v1591_v22, 0.0  ;;  %v949_v41 = vand.u32 2147483647, %v516_v48  ;;  %v3797_v22 = vld [vmem:[#allocation70_spill] sm:$0xff] }
 0x1f1   :  { %v1394_v26 = vadd.f32 %v1393_v25, %v3124_v14  ;;  %v1686_v60 = vadd.f32 %v1685_v34, %v3122_v62  ;;  %1041 = vrot.lane.b32.xlu1 %v948_v55, %s2146_s30  ;;  %1628 = vrot.lane.b32.xlu0 %v1567_v51, %s2145_s0  ;;  %v1275_v14 = vsel %vm1221_vm1, %v1272_v39, %v1274_v12  ;;  %v1276_v62 = vrot.slane %v3190_v31, 1 }
 0x1f2   :  { %v889_v39 = vsub.f32 %v2506_v0, %v804_v43  ;;  %v806_v31 = vrot.slane %v2520_v2, 7  ;;  %v517_v52 = vsub.f32 %v3785_v56, %v3797_v22  ;;  %v1570_v25 = vrot.slane %v1483_v33, 1 }
 0x1f3   :  { %v1004_v16 = vpop.permute.xlu0 %1003  ;;  %v1299_v40 = vpop.permute.xlu1 %1298  ;;  %v1809_v0 = vrot.slane %v1744_v58, 2  ;;  %v1812_v43 = vrot.slane %v1746_v57, 2  ;;  %v808_v56 = vrot.slane %v2517_v5, 7 }
 0x1f4   :  { %v1099_v55 = vsel %vm1079_vm4, %v1004_v16, 0.0  ;;  %v1395_v4 = vsel %vm1374_vm2, %v1299_v40, 0.0  ;;  %v1747_v19 = vand.u32 2147483647, %v889_v39  ;;  %v807_v48 = vsel %vm237_vm0, %v805_v29, %v806_v31 }
 0x1f5   :  { %v1100_v54 = vadd.f32 %v1099_v55, %v1098_v30  ;;  %v1396_v50 = vadd.f32 %v1395_v4, %v1394_v26  ;;  %1630 = vrot.lane.b32.xlu1 %v1569_v63, %s2145_s0  ;;  %1336 = vrot.lane.b32.xlu0 %v1275_v14, %s2145_s0  ;;  %v1277_v26 = vsel %vm1221_vm1, %v1274_v12, %v1276_v62  ;;  %v950_v16 = vand.u32 2147483647, %v517_v52 }
 0x1f6   :  { %v1571_v33 = vsel %vm1221_vm1, %v1568_v45, %v1570_v25  ;;  %v890_v55 = vsub.f32 %v3796_v46, %v805_v29  ;;  %v1813_v58 = vsel %vm1808_vm5, %v1810_v23, %v1812_v43  ;;  %v1814_v61 = vrot.slane %v1747_v19, 2 }
 0x1f7   :  { %v1593_v53 = vpop.permute.xlu0 %1592  ;;  %v1006_v30 = vpop.permute.xlu1 %1005  ;;  %v891_v57 = vsub.f32 %v2520_v2, %v807_v48  ;;  %v809_v39 = vsel %vm237_vm0, %v806_v31, %v808_v56 }
 0x1f8   :  { %v1687_v34 = vsel %vm1374_vm2, %v1593_v53, 0.0  ;;  %v1101_v51 = vsel %vm1079_vm4, %v1006_v30, 0.0  ;;  %v1748_v52 = vand.u32 2147483647, %v890_v55  ;;  %v1815_v2 = vsel %vm1808_vm5, %v1812_v43, %v1814_v61 }
 0x1f9   :  { %v1688_v36 = vadd.f32 %v1687_v34, %v1686_v60  ;;  %v1102_v8 = vadd.f32 %v1101_v51, %v1100_v54  ;;  %1338 = vrot.lane.b32.xlu1 %v1277_v26, %s2145_s0  ;;  %1043 = vrot.lane.b32.xlu0 %v949_v41, %s2146_s30  ;;  %v1811_v54 = vsel %vm1808_vm5, %v1809_v0, %v1810_v23  ;;  %v810_v41 = vrot.slane %v2533_v7, 7 }
 0x1fa   :  { %v1897_v29 = vadd.f32 %v1813_v58, %v1811_v54  ;;  %v892_v31 = vsub.f32 %v2517_v5, %v809_v39  ;;  %v1749_v34 = vand.u32 2147483647, %v891_v57  ;;  %v1816_v19 = vrot.slane %v1748_v52, 2 }
 0x1fb   :  { %v1301_v40 = vpop.permute.xlu0 %1300  ;;  %v1595_v14 = vpop.permute.xlu1 %1594  ;;  %v811_v51 = vsel %vm237_vm0, %v808_v56, %v810_v41  ;;  %v812_v5 = vrot.slane %v2530_v59, 7  ;;  %v813_v56 = vrot.slane %v2547_v6, 7  ;;  %v815_v57 = vrot.slane %v2544_v9, 7 }
 0x1fc   :  { %v1397_v12 = vsel %vm1380_vm3, %v1301_v40, 0.0  ;;  %v1689_v60 = vsel %vm1380_vm3, %v1595_v14, 0.0  ;;  %v1817_v40 = vrot.slane %v1749_v34, 2  ;;  %v893_v43 = vsub.f32 %v2533_v7, %v811_v51 }
 0x1fd   :  { %v1398_v4 = vadd.f32 %v1397_v12, %v1396_v50  ;;  %v1690_v63 = vadd.f32 %v1689_v60, %v1688_v36  ;;  %1045 = vrot.lane.b32.xlu1 %v950_v16, %s2146_s30  ;;  %1632 = vrot.lane.b32.xlu0 %v1571_v33, %s2145_s0  ;;  %v814_v7 = vsel %vm237_vm0, %v812_v5, %v813_v56  ;;  %v817_v34 = vrot.slane %v2560_v11, 7 }
 0x1fe   :  { %v1818_v54 = vsel %vm1808_vm5, %v1816_v19, %v1817_v40 }
 0x1ff   :  { %v1008_v45 = vpop.permute.xlu0 %1007  ;;  %v1303_v22 = vpop.permute.xlu1 %1302 }
 0x200   :  { %v1103_v50 = vsel %vm1079_vm4, %v1008_v45, 0.0  ;;  %v1399_v46 = vsel %vm1374_vm2, %v1303_v22, 0.0 }
 0x201   :  { %v1104_v53 = vadd.f32 %v1103_v50, %v1102_v8  ;;  %v1400_v30 = vadd.f32 %v1399_v46, %v1398_v4  ;;  %1634 = vrot.lane.b32.xlu1 %v1570_v25, %s2145_s0  ;;  %1340 = vrot.lane.b32.xlu0 %v1276_v62, %s2145_s0  ;;  %v1898_v8 = vadd.f32 %v1897_v29, %v1815_v2  ;;  %v1899_v25 = vsel %vm1808_vm5, %v1814_v61, 0.0 }
 0x202   :  { %v1750_v62 = vand.u32 2147483647, %v892_v31  ;;  %v1751_v61 = vand.u32 2147483647, %v893_v43  ;;  %v894_v46 = vsub.f32 %v2530_v59, %v812_v5  ;;  %v895_v2 = vsub.f32 %v2547_v6, %v814_v7 }
 0x203   :  { %v1597_v26 = vpop.permute.xlu0 %1596  ;;  %v1010_v36 = vpop.permute.xlu1 %1009  ;;  %v1900_v55 = vadd.f32 %v1899_v25, %v1898_v8  ;;  %v816_v31 = vsel %vm237_vm0, %v813_v56, %v815_v57  ;;  %v818_v6 = vsel %vm237_vm0, %v815_v57, %v817_v34 }
 0x204   :  { %v1691_v0 = vsel %vm1374_vm2, %v1597_v26, 0.0  ;;  %v1105_v23 = vsel %vm1079_vm4, %v1010_v36, 0.0  ;;  %v1819_v58 = vrot.slane %v1750_v62, 2  ;;  %v1752_v19 = vand.u32 2147483647, %v894_v46 }
 0x205   :  { %v1692_v48 = vadd.f32 %v1691_v0, %v1690_v63  ;;  %v1106_v16 = vadd.f32 %v1105_v23, %v1104_v53  ;;  %v1901_v50 = vadd.f32 %v1900_v55, %v1818_v54  ;;  %v1753_v25 = vand.u32 2147483647, %v895_v2 }
 0x206   :  { %v1820_v53 = vsel %vm1808_vm5, %v1817_v40, %v1819_v58  ;;  %v1823_v56 = vrot.slane %v1752_v19, 2  ;;  %v820_v54 = vrot.slane %v2574_v10, 7 }
 0x207   :  { %v1305_v14 = vpop.permute.xlu0 %1304  ;;  %v1599_v12 = vpop.permute.xlu1 %1598  ;;  %v1902_v23 = vadd.f32 %v1901_v50, %v1820_v53  ;;  %v822_v50 = vrot.slane %v2571_v13, 7 }
 0x208   :  { %v1401_v60 = vsel %vm1374_vm2, %v1305_v14, 0.0  ;;  %v1693_v33 = vsel %vm1374_vm2, %v1599_v12, 0.0 }
 0x209   :  { %v1402_v4 = vadd.f32 %v1401_v60, %v1400_v30  ;;  %v1694_v63 = vadd.f32 %v1693_v33, %v1692_v48  ;;  %v1821_v30 = vrot.slane %v1751_v61, 2 }
 0x20b   :  { %v1012_v39 = vpop.permute.xlu0 %1011  ;;  %v1307_v41 = vpop.permute.xlu1 %1306  ;;  %v1822_v48 = vsel %vm1808_vm5, %v1819_v58, %v1821_v30  ;;  %v1904_v33 = vsel %vm1808_vm5, %v1821_v30, 0.0 }
 0x20c   :  { %v1107_v45 = vsel %vm1079_vm4, %v1012_v39, 0.0  ;;  %v1403_v22 = vsel %vm1374_vm2, %v1307_v41, 0.0  ;;  %v1903_v14 = vadd.f32 %v1902_v23, %v1822_v48 }
 0x20d   :  { %v1108_v29 = vadd.f32 %v1107_v45, %v1106_v16  ;;  %v1404_v52 = vadd.f32 %v1403_v22, %v1402_v4  ;;  %v896_v16 = vsub.f32 %v2544_v9, %v816_v31  ;;  %v1824_v4 = vrot.slane %v1753_v25, 2 }
 0x20e   :  { %v897_v9 = vsub.f32 %v2560_v11, %v818_v6  ;;  %v1905_v7 = vadd.f32 %v1904_v33, %v1903_v14  ;;  %v826_v14 = vrot.slane %v3750_v27, 7  ;;  %v827_v33 = vrot.slane %v3751_v3, 7 }
 0x20f   :  { %v1601_v51 = vpop.permute.xlu0 %1600  ;;  %v1014_v26 = vpop.permute.xlu1 %1013  ;;  %v1754_v55 = vand.u32 2147483647, %v896_v16  ;;  %v1825_v41 = vsel %vm1808_vm5, %v1823_v56, %v1824_v4 }
 0x210   :  { %v1695_v36 = vsel %vm1374_vm2, %v1601_v51, 0.0  ;;  %v1109_v0 = vsel %vm1079_vm4, %v1014_v26, 0.0  ;;  %v1755_v22 = vand.u32 2147483647, %v897_v9  ;;  %v1906_v53 = vadd.f32 %v1905_v7, %v1825_v41 }
 0x211   :  { %v1696_v59 = vadd.f32 %v1695_v36, %v1694_v63  ;;  %v1110_v8 = vadd.f32 %v1109_v0, %v1108_v29  ;;  %v819_v63 = vrot.slane %v2557_v44, 7  ;;  %v1826_v45 = vrot.slane %v1754_v55, 2 }
 0x212   :  { %v1828_v34 = vrot.slane %v1755_v22, 2  ;;  %v823_v26 = vsel %vm237_vm0, %v820_v54, %v822_v50  ;;  %v824_v36 = vrot.slane %v3745_v15, 7  ;;  %v902_v41 = vsub.f32 %v3750_v27, %v826_v14 }
 0x213   :  { %v1309_v62 = vpop.permute.xlu0 %1308  ;;  %v1603_v40 = vpop.permute.xlu1 %1602  ;;  %v821_v46 = vsel %vm237_vm0, %v819_v63, %v820_v54  ;;  %v898_v30 = vsub.f32 %v2557_v44, %v819_v63  ;;  %v1827_v31 = vsel %vm1808_vm5, %v1824_v4, %v1826_v45  ;;  %v900_v44 = vsub.f32 %v2571_v13, %v823_v26 }
 0x214   :  { %v1405_v43 = vsel %vm1380_vm3, %v1309_v62, 0.0  ;;  %v1697_v5 = vsel %vm1380_vm3, %v1603_v40, 0.0  ;;  %v899_v51 = vsub.f32 %v2574_v10, %v821_v46  ;;  %v1907_v19 = vadd.f32 %v1906_v53, %v1827_v31 }
 0x215   :  { %v3271_v12 = vadd.f32 %v1405_v43, %v1404_v52  ;;  %v3273_v60 = vadd.f32 %v1697_v5, %v1696_v59  ;;  %v1756_v59 = vand.u32 2147483647, %v898_v30  ;;  %v825_v16 = vsel %vm237_vm0, %v822_v50, %v824_v36 }
 0x216   :  { %v1757_v48 = vand.u32 2147483647, %v899_v51  ;;  %v1909_v40 = vsel %vm1808_vm5, %v1828_v34, 0.0  ;;  %v1758_v43 = vand.u32 2147483647, %v900_v44  ;;  %v901_v56 = vsub.f32 %v3745_v15, %v825_v16 }
 0x217   :  { %v1016_v58 = vpop.permute.xlu0 %1015  ;;  %v3279_v61 = vpop.permute.xlu1 %1310  ;;  %v1830_v6 = vrot.slane %v1756_v59, 2  ;;  %v1760_v31 = vand.u32 2147483647, %v902_v41 }
 0x218   :  { %v1111_v57 = vsel %vm1079_vm4, %v1016_v58, 0.0  ;;  %v1831_v5 = vrot.slane %v1757_v48, 2  ;;  %v1833_v63 = vrot.slane %v1758_v43, 2  ;;  %v1759_v54 = vand.u32 2147483647, %v901_v56 }
 0x219   :  { %v1112_v39 = vadd.f32 %v1111_v57, %v1110_v8  ;;  %v1829_v8 = vsel %vm1808_vm5, %v1826_v45, %v1828_v34  ;;  %v829_v58 = vrot.slane %v3753_v24, 7  ;;  %v828_v57 = vsel %vm237_vm0, %v826_v14, %v827_v33 }
 0x21a   :  { %v1908_v62 = vadd.f32 %v1907_v19, %v1829_v8  ;;  %v1832_v9 = vsel %vm1808_vm5, %v1830_v6, %v1831_v5  ;;  %v1834_v45 = vsel %vm1808_vm5, %v1831_v5, %v1833_v63  ;;  %v1835_v22 = vrot.slane %v1759_v54, 2 }
 0x21b   :  { %v3285_v11 = vpop.permute.xlu0 %1604  ;;  %v1018_v29 = vpop.permute.xlu1 %1017  ;;  %v903_v50 = vsub.f32 %v3751_v3, %v828_v57  ;;  %v830_v46 = vsel %vm237_vm0, %v827_v33, %v829_v58  ;;  %v1837_v19 = vrot.slane %v1760_v31, 2  ;;  %v833_v6 = vrot.slane %v3762_v47, 7 }
 0x21c   :  { %v1113_v52 = vsel %vm1079_vm4, %v1018_v29, 0.0  ;;  %v1910_v4 = vadd.f32 %v1909_v40, %v1908_v62  ;;  %v831_v29 = vrot.slane %v3757_v38, 7  ;;  %v1836_v34 = vsel %vm1808_vm5, %v1833_v63, %v1835_v22 }
 0x21d   :  { %v3289_v2 = vadd.f32 %v1113_v52, %v1112_v39  ;;  %v904_v51 = vsub.f32 %v3753_v24, %v830_v46  ;;  %v1761_v27 = vand.u32 2147483647, %v903_v50  ;;  %v1914_v8 = vsel %vm1808_vm5, %v1835_v22, 0.0 }
 0x21e   :  { %v1911_v39 = vadd.f32 %v1910_v4, %v1832_v9  ;;  %v832_v26 = vsel %vm237_vm0, %v829_v58, %v831_v29  ;;  %v834_v62 = vrot.slane %v3763_v21, 7  ;;  %v836_v33 = vrot.slane %v3765_v1, 7 }
 0x21f   :  { %v3295_v0 = vpop.permute.xlu0 %1312  ;;  %v3297_v23 = vpop.permute.xlu1 %1606  ;;  %v1762_v44 = vand.u32 2147483647, %v904_v51  ;;  %v1838_v48 = vrot.slane %v1761_v27, 2  ;;  %v905_v16 = vsub.f32 %v3757_v38, %v832_v26  ;;  %v906_v54 = vsub.f32 %v3762_v47, %v833_v6 }
 0x220   :  { %v1912_v30 = vadd.f32 %v1911_v39, %v1834_v45  ;;  %v835_v4 = vsel %vm237_vm0, %v833_v6, %v834_v62  ;;  %v837_v41 = vsel %vm237_vm0, %v834_v62, %v836_v33  ;;  %v838_v45 = vrot.slane %v3769_v35, 7 }
 0x221   :  { %v1839_v5 = vsel %vm1808_vm5, %v1837_v19, %v1838_v48  ;;  %v1840_v56 = vrot.slane %v1762_v44, 2  ;;  %v1763_v14 = vand.u32 2147483647, %v905_v16  ;;  %v907_v39 = vsub.f32 %v3763_v21, %v835_v4 }
 0x222   :  { %v1913_v59 = vadd.f32 %v1912_v30, %v1836_v34  ;;  %v1764_v29 = vand.u32 2147483647, %v906_v54  ;;  %v908_v31 = vsub.f32 %v3765_v1, %v837_v41  ;;  %v839_v34 = vsel %vm237_vm0, %v836_v33, %v838_v45 }
 0x223   :  { %v3302_v25 = vpop.permute.xlu0 %1019  ;;  %v3304_v10 = vpop.permute.xlu1 %1314  ;;  %v1841_v58 = vsel %vm1808_vm5, %v1838_v48, %v1840_v56  ;;  %v1842_v57 = vrot.slane %v1763_v14, 2  ;;  %v1765_v47 = vand.u32 2147483647, %v907_v39  ;;  %v909_v48 = vsub.f32 %v3769_v35, %v839_v34 }
 0x224   :  { %v1915_v43 = vadd.f32 %v1914_v8, %v1913_v59  ;;  %v1844_v27 = vrot.slane %v1764_v29, 2  ;;  %v840_v59 = vrot.slane %v3774_v17, 7  ;;  %v1766_v8 = vand.u32 2147483647, %v908_v31 }
 0x225   :  { %v1843_v30 = vsel %vm1808_vm5, %v1840_v56, %v1842_v57  ;;  %v1919_v26 = vsel %vm1808_vm5, %v1842_v57, 0.0  ;;  %v1845_v44 = vrot.slane %v1765_v47, 2  ;;  %v841_v16 = vrot.slane %v3775_v37, 7 }
 0x226   :  { %v1916_v63 = vadd.f32 %v1915_v43, %v1839_v5  ;;  %v843_v43 = vrot.slane %v3777_v32, 7  ;;  %v1847_v56 = vrot.slane %v1766_v8, 2  ;;  %v1767_v14 = vand.u32 2147483647, %v909_v48 }
 0x227   :  { %v3310_v13 = vpop.permute.xlu0 %1608  ;;  %v3312_v55 = vpop.permute.xlu1 %1021  ;;  %v1846_v5 = vsel %vm1808_vm5, %v1844_v27, %v1845_v44  ;;  %v842_v33 = vsel %vm237_vm0, %v840_v59, %v841_v16  ;;  %v845_v35 = vrot.slane %v3781_v20, 7 }
 0x228   :  { %v1917_v46 = vadd.f32 %v1916_v63, %v1841_v58  ;;  %v910_v58 = vsub.f32 %v3774_v17, %v840_v59  ;;  %v844_v57 = vsel %vm237_vm0, %v841_v16, %v843_v43  ;;  %v911_v39 = vsub.f32 %v3775_v37, %v842_v33 }
 0x229   :  { %v1848_v41 = vsel %vm1808_vm5, %v1845_v44, %v1847_v56  ;;  %v1849_v45 = vrot.slane %v1767_v14, 2  ;;  %v912_v31 = vsub.f32 %v3777_v32, %v844_v57  ;;  %v1407_v44 = vsel %vm1374_vm2, %v3279_v61, 0.0 }
 0x22a   :  { %v1918_v19 = vadd.f32 %v1917_v46, %v1843_v30  ;;  %v846_v30 = vsel %vm237_vm0, %v843_v43, %v845_v35  ;;  %v1768_v34 = vand.u32 2147483647, %v910_v58  ;;  %v1769_v27 = vand.u32 2147483647, %v911_v39 }
 0x22b   :  { %v3317_v7 = vpop.permute.xlu0 %1316  ;;  %v3319_v15 = vpop.permute.xlu1 %1610  ;;  %v1850_v17 = vsel %vm1808_vm5, %v1847_v56, %v1849_v45  ;;  %v913_v37 = vsub.f32 %v3781_v20, %v846_v30  ;;  %v1699_v32 = vsel %vm1374_vm2, %v3285_v11, 0.0  ;;  %v1770_v48 = vand.u32 2147483647, %v912_v31 }
 0x22c   :  { %v1920_v62 = vadd.f32 %v1919_v26, %v1918_v19  ;;  %v847_v26 = vrot.slane %v3786_v18, 7  ;;  %v848_v19 = vrot.slane %v3787_v49, 7  ;;  %v1851_v16 = vrot.slane %v1768_v34, 2 }
 0x22d   :  { %v1852_v43 = vrot.slane %v1769_v27, 2  ;;  %v1409_v20 = vsel %vm1374_vm2, %v3295_v0, 0.0  ;;  %v1701_v56 = vsel %vm1374_vm2, %v3297_v23, 0.0  ;;  %v850_v14 = vrot.slane %v3789_v42, 7 }
 0x22e   :  { %v1921_v54 = vadd.f32 %v1920_v62, %v1846_v5  ;;  %v1924_v5 = vsel %vm1808_vm5, %v1849_v45, 0.0  ;;  %v1408_v33 = vadd.f32 %v1407_v44, %v3271_v12  ;;  %v1700_v61 = vadd.f32 %v1699_v32, %v3273_v60 }
 0x22f   :  { %v3326_v52 = vpop.permute.xlu0 %1023  ;;  %v3328_v53 = vpop.permute.xlu1 %1318  ;;  %v3419_v58 = vand.u32 2147483647, %v913_v37  ;;  %v914_v57 = vsub.f32 %v3786_v18, %v847_v26  ;;  %v1411_v0 = vsel %vm1374_vm2, %v3304_v10, 0.0  ;;  %v1703_v23 = vsel %vm1374_vm2, %v3310_v13, 0.0 }
 0x230   :  { %v1922_v47 = vadd.f32 %v1921_v54, %v1848_v41  ;;  %v849_v54 = vsel %vm237_vm0, %v847_v26, %v848_v19  ;;  %v1854_v39 = vrot.slane %v1770_v48, 2  ;;  %v1410_v41 = vadd.f32 %v1409_v20, %v1408_v33 }
 0x231   :  { %v1702_v60 = vadd.f32 %v1701_v56, %v1700_v61  ;;  %v1853_v45 = vsel %vm1808_vm5, %v1851_v16, %v1852_v43  ;;  %v1413_v30 = vsel %vm1380_vm3, %v3317_v7, 0.0  ;;  %v1705_v31 = vsel %vm1380_vm3, %v3319_v15, 0.0 }
 0x232   :  { %v1923_v62 = vadd.f32 %v1922_v47, %v1850_v17  ;;  %v851_v18 = vsel %vm237_vm0, %v848_v19, %v850_v14  ;;  %v915_v47 = vsub.f32 %v3787_v49, %v849_v54  ;;  %v1412_v10 = vadd.f32 %v1411_v0, %v1410_v41 }
 0x233   :  { %v3333_v36 = vpop.permute.xlu0 %1612  ;;  %v3335_v3 = vpop.permute.xlu1 %1025  ;;  %v1704_v34 = vadd.f32 %v1703_v23, %v1702_v60  ;;  %v852_v17 = vrot.slane %v3794_v28, 7  ;;  %v1856_v26 = vrot.slane %v3419_v58, 2  ;;  %v1115_v7 = vsel %vm1079_vm4, %v3302_v25, 0.0 }
 0x234   :  { %v1925_v12 = vadd.f32 %v1924_v5, %v1923_v62  ;;  %v1415_v15 = vsel %vm1374_vm2, %v3328_v53, 0.0  ;;  %v1707_v37 = vsel %vm1374_vm2, %v3333_v36, 0.0  ;;  %v1855_v49 = vsel %vm1808_vm5, %v1852_v43, %v1854_v39 }
 0x235   :  { %v1414_v19 = vadd.f32 %v1413_v30, %v1412_v10  ;;  %v1706_v44 = vadd.f32 %v1705_v31, %v1704_v34  ;;  %v916_v32 = vsub.f32 %v3789_v42, %v851_v18  ;;  %v1117_v16 = vsel %vm1079_vm4, %v3312_v55, 0.0 }
 0x236   :  { %v1926_v48 = vadd.f32 %v1925_v12, %v1853_v45  ;;  %v1772_v53 = vand.u32 2147483647, %v914_v57  ;;  %v1116_v5 = vadd.f32 %v1115_v7, %v3289_v2  ;;  %v3456_v33 = vand.u32 2147483647, %v915_v47 }
 0x237   :  { %v3341_v24 = vpop.permute.xlu0 %1320  ;;  %v3343_v40 = vpop.permute.xlu1 %1614  ;;  %v1416_v36 = vadd.f32 %v1415_v15, %v1414_v19  ;;  %v1708_v20 = vadd.f32 %v1707_v37, %v1706_v44  ;;  %v1119_v42 = vsel %vm1079_vm4, %v3326_v52, 0.0  ;;  %v1857_v58 = vsel %vm1808_vm5, %v1854_v39, %v1856_v26 }
 0x238   :  { %v1417_v62 = vsel %vm1374_vm2, %v3341_v24, 0.0  ;;  %v1709_v25 = vsel %vm1374_vm2, %v3343_v40, 0.0  ;;  %v853_v40 = vsel %vm237_vm0, %v850_v14, %v852_v17  ;;  %v1118_v61 = vadd.f32 %v1117_v16, %v1116_v5 }
 0x239   :  { %v1418_v2 = vadd.f32 %v1417_v62, %v1416_v36  ;;  %v1710_v54 = vadd.f32 %v1709_v25, %v1708_v20  ;;  %v1121_v57 = vsel %vm1079_vm4, %v3335_v3, 0.0  ;;  %v917_v60 = vsub.f32 %v3794_v28, %v853_v40 }
 0x23a   :  { %v1120_v23 = vadd.f32 %v1119_v42, %v1118_v61  ;;  %v3479_v45 = vand.u32 2147483647, %v916_v32  ;;  %v1858_v18 = vrot.slane %v1772_v53, 2 }
 0x23b   :  { %v3348_v9 = vpop.permute.xlu0 %1027  ;;  %v3350_v38 = vpop.permute.xlu1 %1322  ;;  %v1775_v32 = vand.u32 2147483647, %v917_v60 }
 0x23c   :  { %v1419_v55 = vsel %vm1374_vm2, %v3350_v38, 0.0  ;;  %v1927_v38 = vadd.f32 %v1926_v48, %v1855_v49  ;;  %v1123_v39 = vsel %vm1079_vm4, %v3348_v9, 0.0  ;;  %v1929_v49 = vsel %vm1808_vm5, %v1856_v26, 0.0 }
 0x23d   :  { %v1420_v12 = vadd.f32 %v1419_v55, %v1418_v2 }
 0x23e   :  { %v1928_v15 = vadd.f32 %v1927_v38, %v1857_v58 }
 0x23f   :  { %v3357_v22 = vpop.permute.xlu0 %1616  ;;  %v3359_v50 = vpop.permute.xlu1 %1029 }
 0x240   :  { %v1711_v24 = vsel %vm1374_vm2, %v3357_v22, 0.0  ;;  %v1125_v47 = vsel %vm1079_vm4, %v3359_v50, 0.0  ;;  %v1930_v5 = vadd.f32 %v1929_v49, %v1928_v15 }
 0x241   :  { %v1712_v22 = vadd.f32 %v1711_v24, %v1710_v54 }
 0x243   :  { %v3364_v51 = vpop.permute.xlu0 %1324  ;;  %v3366_v21 = vpop.permute.xlu1 %1618 }
 0x244   :  { %v1421_v0 = vsel %vm1380_vm3, %v3364_v51, 0.0  ;;  %v1713_v52 = vsel %vm1380_vm3, %v3366_v21, 0.0  ;;  %v1122_v21 = vadd.f32 %v1121_v57, %v1120_v23 }
 0x245   :  { %v1422_v30 = vadd.f32 %v1421_v0, %v1420_v12  ;;  %v1714_v31 = vadd.f32 %v1713_v52, %v1712_v22 }
 0x246   :  { %v1124_v10 = vadd.f32 %v1123_v39, %v1122_v21 }
 0x247   :  { %v3372_v1 = vpop.permute.xlu0 %1031  ;;  %v3374_v6 = vpop.permute.xlu1 %1326 }
 0x248   :  { %v1423_v3 = vsel %vm1374_vm2, %v3374_v6, 0.0  ;;  %v1859_v6 = vrot.slane %v3456_v33, 2  ;;  %v1127_v37 = vsel %vm1079_vm4, %v3372_v1, 0.0 }
 0x249   :  { %v1424_v34 = vadd.f32 %v1423_v3, %v1422_v30 }
 0x24b   :  { %v3379_v4 = vpop.permute.xlu0 %1620  ;;  %v3381_v63 = vpop.permute.xlu1 %1033 }
 0x24c   :  { %v1715_v51 = vsel %vm1374_vm2, %v3379_v4, 0.0  ;;  %v1129_v48 = vsel %vm1079_vm4, %v3381_v63, 0.0 }
 0x24d   :  { %v1716_v4 = vadd.f32 %v1715_v51, %v1714_v31 }
 0x24f   :  { %v3388_v46 = vpop.permute.xlu0 %1328  ;;  %v3390_v29 = vpop.permute.xlu1 %1622 }
 0x250   :  { %v1425_v28 = vsel %vm1374_vm2, %v3388_v46, 0.0  ;;  %v1717_v9 = vsel %vm1374_vm2, %v3390_v29, 0.0  ;;  %v1126_v29 = vadd.f32 %v1125_v47, %v1124_v10 }
 0x251   :  { %v1426_v19 = vadd.f32 %v1425_v28, %v1424_v34  ;;  %v1718_v44 = vadd.f32 %v1717_v9, %v1716_v4 }
 0x252   :  { %v1128_v62 = vadd.f32 %v1127_v37, %v1126_v29 }
 0x253   :  { %v3398_v59 = vpop.permute.xlu0 %1035  ;;  %v3400_v8 = vpop.permute.xlu1 %1330 }
 0x254   :  { %v1427_v50 = vsel %vm1374_vm2, %v3400_v8, 0.0  ;;  %v1861_v8 = vrot.slane %v3479_v45, 2  ;;  %v1131_v36 = vsel %vm1079_vm4, %v3398_v59, 0.0  ;;  %v1130_v33 = vadd.f32 %v1129_v48, %v1128_v62 }
 0x255   :  { %v1428_v25 = vadd.f32 %v1427_v50, %v1426_v19 }
 0x256   :  { %v1862_v61 = vsel %vm1808_vm5, %v1859_v6, %v1861_v8  ;;  %v1132_v2 = vadd.f32 %v1131_v36, %v1130_v33 }
 0x257   :  { %v3414_v35 = vpop.permute.xlu0 %1624  ;;  %v3416_v11 = vpop.permute.xlu1 %1037 }
 0x258   :  { %v1719_v46 = vsel %vm1374_vm2, %v3414_v35, 0.0  ;;  %v1133_v55 = vsel %vm1079_vm4, %v3416_v11, 0.0  ;;  %v1863_v11 = vrot.slane %v1775_v32, 2 }
 0x259   :  { %v1720_v35 = vadd.f32 %v1719_v46, %v1718_v44  ;;  %v1134_v23 = vadd.f32 %v1133_v55, %v1132_v2 }
 0x25a   :  { %v1934_v34 = vsel %vm1808_vm5, %v1863_v11, 0.0 }
 0x25b   :  { %v3433_v27 = vpop.permute.xlu0 %1332  ;;  %v3435_v13 = vpop.permute.xlu1 %1626 }
 0x25c   :  { %v1429_v16 = vsel %vm1380_vm3, %v3433_v27, 0.0  ;;  %v1721_v1 = vsel %vm1380_vm3, %v3435_v13, 0.0  ;;  %v1860_v27 = vsel %vm1808_vm5, %v1858_v18, %v1859_v6  ;;  %v1864_v18 = vsel %vm1808_vm5, %v1861_v8, %v1863_v11 }
 0x25d   :  { %v1430_v42 = vadd.f32 %v1429_v16, %v1428_v25  ;;  %v1722_v13 = vadd.f32 %v1721_v1, %v1720_v35  ;;  %v1931_v57 = vadd.f32 %v1930_v5, %v1860_v27 }
 0x25f   :  { %v3454_v43 = vpop.permute.xlu0 %1039  ;;  %v1335_v56 = vpop.permute.xlu1 %1334  ;;  %v1932_v21 = vadd.f32 %v1931_v57, %v1862_v61 }
 0x260   :  { %v1431_v20 = vsel %vm1374_vm2, %v1335_v56, 0.0  ;;  %v1135_v0 = vsel %vm1079_vm4, %v3454_v43, 0.0 }
 0x261   :  { %v1432_v59 = vadd.f32 %v1431_v20, %v1430_v42  ;;  %v1136_v60 = vadd.f32 %v1135_v0, %v1134_v23  ;;  %v1933_v10 = vadd.f32 %v1932_v21, %v1864_v18 }
 0x263   :  { %v1629_v41 = vpop.permute.xlu0 %1628  ;;  %v1042_v14 = vpop.permute.xlu1 %1041 }
 0x264   :  { %v1723_v63 = vsel %vm1374_vm2, %v1629_v41, 0.0  ;;  %v1137_v41 = vsel %vm1079_vm4, %v1042_v14, 0.0 }
 0x265   :  { %v1724_v54 = vadd.f32 %v1723_v63, %v1722_v13  ;;  %v1138_v47 = vadd.f32 %v1137_v41, %v1136_v60 }
 0x267   :  { %v1337_v17 = vpop.permute.xlu0 %1336  ;;  %v1631_v7 = vpop.permute.xlu1 %1630 }
 0x268   :  { %v1433_v24 = vsel %vm1374_vm2, %v1337_v17, 0.0  ;;  %v1725_v40 = vsel %vm1374_vm2, %v1631_v7, 0.0  ;;  %v1935_v17 = vadd.f32 %v1934_v34, %v1933_v10  ;;  %v2147_v7 = vmov 0.0  }
 0x269   :  { %v1434_v12 = vadd.f32 %v1433_v24, %v1432_v59  ;;  %v1726_v22 = vadd.f32 %v1725_v40, %v1724_v54  ;;  %41 = vst.msk [vmem:[#allocation5] sm:$0x1] %vm40_vm6, %v2147_v7  ;;  %42 = vst.msk [vmem:[#allocation6] sm:$0x1] %vm40_vm6, %v2147_v7 }
 0x26a   :  { %43 = vst.msk [vmem:[#allocation8] sm:$0x1] %vm40_vm6, %v2147_v7  ;;  %44 = vst.msk [vmem:[#allocation9] sm:$0x1] %vm40_vm6, %v2147_v7 }
 0x26b   :  { %v1044_v53 = vpop.permute.xlu0 %1043  ;;  %v1339_v26 = vpop.permute.xlu1 %1338 }
 0x26c   :  { %v1435_v52 = vsel %vm1374_vm2, %v1339_v26, 0.0  ;;  %v1139_v30 = vsel %vm1079_vm4, %v1044_v53, 0.0 }
 0x26d   :  { %v1436_v39 = vadd.f32 %v1435_v52, %v1434_v12  ;;  %v1140_v14 = vadd.f32 %v1139_v30, %v1138_v47 }
 0x26f   :  { %v1633_v56 = vpop.permute.xlu0 %1632  ;;  %v1046_v58 = vpop.permute.xlu1 %1045 }
 0x270   :  { %v1727_v38 = vsel %vm1374_vm2, %v1633_v56, 0.0  ;;  %v1141_v6 = vsel %vm1079_vm4, %v1046_v58, 0.0  ;;  %v918_v40 = vld [vmem:[#allocation5] sm:$0x1]  ;;  %v1156_v61 = vld [vmem:[#allocation6] sm:$0x1] }
 0x271   :  { %v1728_v3 = vadd.f32 %v1727_v38, %v1726_v22  ;;  %v1142_v4 = vadd.f32 %v1141_v6, %v1140_v14  ;;  %v1451_v59 = vld [vmem:[#allocation8] sm:$0x1]  ;;  %v1743_v0 = vld [vmem:[#allocation9] sm:$0x1] }
 0x273   :  { %v1341_v51 = vpop.permute.xlu0 %1340  ;;  %v1635_v45 = vpop.permute.xlu1 %1634 }
 0x274   :  { %v1437_v43 = vsel %vm1380_vm3, %v1341_v51, 0.0  ;;  %v1729_v31 = vsel %vm1380_vm3, %v1635_v45, 0.0 }
 0x275   :  { %v1438_v28 = vadd.f32 %v1437_v43, %v1436_v39  ;;  %v1730_v9 = vadd.f32 %v1729_v31, %v1728_v3 }
 0x277   :  { %1439 = vadd.xlane.f32.xlu1 %v1438_v28  ;;  %1731 = vadd.xlane.f32.xlu0 %v1730_v9 }
 0x27b   :  { %1143 = vadd.xlane.f32.xlu0 %v1142_v4 }
 0x27f   :  { %1936 = vadd.xlane.f32.xlu0 %v1935_v17 }
 0x304   :  { %v1732_v15 = vpop.xlane.xlu0 %1731  ;;  %v1440_v37 = vpop.xlane.xlu1 %1439 }
 0x305   :  { %v1733_v50 = vrot.slane %v1732_v15, 4  ;;  %v1441_v46 = vrot.slane %v1440_v37, 4 }
 0x307   :  { %v1734_v49 = vadd.f32 %v1733_v50, %v1732_v15  ;;  %v1442_v29 = vadd.f32 %v1441_v46, %v1440_v37 }
 0x308   :  { %v1144_v19 = vpop.xlane.xlu0 %1143 }
 0x309   :  { %v1735_v44 = vrot.slane %v1734_v49, 2  ;;  %v1443_v32 = vrot.slane %v1442_v29, 2  ;;  %v1145_v48 = vrot.slane %v1144_v19, 4 }
 0x30b   :  { %v1146_v16 = vadd.f32 %v1145_v48, %v1144_v19  ;;  %v1444_v1 = vadd.f32 %v1443_v32, %v1442_v29  ;;  %v1736_v35 = vadd.f32 %v1735_v44, %v1734_v49 }
 0x30c   :  { %v1937_v8 = vpop.xlane.xlu0 %1936 }
 0x30d   :  { %v1147_v62 = vrot.slane %v1146_v16, 2  ;;  %v1938_v25 = vrot.slane %v1937_v8, 4  ;;  %v1445_v5 = vrot.slane %v1444_v1, 1  ;;  %v1737_v63 = vrot.slane %v1736_v35, 1 }
 0x30f   :  { %v1939_v53 = vadd.f32 %v1938_v25, %v1937_v8  ;;  %v1148_v26 = vadd.f32 %v1147_v62, %v1146_v16  ;;  %v1446_v42 = vadd.f32 %v1445_v5, %v1444_v1  ;;  %v1738_v13 = vadd.f32 %v1737_v63, %v1736_v35 }
 0x311   :  { %v1940_v36 = vrot.slane %v1939_v53, 2  ;;  %v1149_v20 = vrot.slane %v1148_v26, 1 }
 0x313   :  { %v1941_v27 = vadd.f32 %v1940_v36, %v1939_v53  ;;  %v1150_v33 = vadd.f32 %v1149_v20, %v1148_v26 }
 0x315   :  { %2004 = vpush %v1150_v33  ;;  %v1942_v55 = vrot.slane %v1941_v27, 1 }
 0x316   :  { %2006 = vpush %v1446_v42 }
 0x317   :  { %2008 = vpush %v1738_v13  ;;  %v1943_v24 = vadd.f32 %v1942_v55, %v1941_v27 }
 0x319   :  { %2010 = vpush %v1943_v24 }
 0x346   :  { %s2005_s9 = spop %2004 }
 0x347   :  { %v1152_v2 = vstv %s2005_s9  ;;  %s2007_s12 = spop %2006 }
 0x348   :  { %v1153_v54 = vadd.f32 %v1152_v2, %v918_v40  ;;  %v1448_v56 = vstv %s2007_s12  ;;  %s2009_s15 = spop %2008 }
 0x349   :  { %v1449_v58 = vadd.f32 %v1448_v56, %v1156_v61  ;;  %v1740_v57 = vstv %s2009_s15 }
 0x34a   :  { %1155 = vst.msk [vmem:[#allocation5] sm:$0x1] %vm40_vm6, %v1153_v54  ;;  %v1741_v52 = vadd.f32 %v1740_v57, %v1451_v59  ;;  %s2011_s16 = spop %2010 }
 0x34b   :  { %1450 = vst.msk [vmem:[#allocation6] sm:$0x1] %vm40_vm6, %v1449_v58  ;;  %v1945_v38 = vstv %s2011_s16 }
 0x34c   :  { %2056 = shalt.err (!%p2053_p12)
}
 0x34d   :  { %s2057_s21 = scalar_lea.hbm %s3604_s1, 16 }
 0x34e   :  { %p2058_p13 = scmp.ne.s32.totalorder %s3604_s1, %s2057_s21  ;;  %p2061_p0 = scmp.lt.u32.totalorder %s2057_s21, %s3604_s1 }
 0x350   :  { %p2063_p1 = pnand %p2061_p0, %p2058_p13 }
 0x352   :  { %2066 = shalt.err (!%p2063_p1)
}
 0x353   :  { %1957 = dma.vmem_to_hbm [thread:$0]  %s1955_s8, 16, %s3604_s1, [#allocation4]   ;;  %1742 = vst.msk [vmem:[#allocation8] sm:$0x1] %vm40_vm6, %v1741_v52  ;;  %v1946_v11 = vadd.f32 %v1945_v38, %v1743_v0 }
 0x354   :  { %s2067_s28 = scalar_lea.vmem %s3527_s6, 16  ;;  %s2071_s29 = scalar_lea.vmem %s3527_s6, 32 }
 0x355   :  { %p2068_p2 = scmp.ne.s32.totalorder %s3527_s6, %s2067_s28  ;;  %p2072_p3 = scmp.lt.s32.totalorder %s3527_s6, %s3527_s6 }
 0x356   :  { %p2073_p4 = scmp.lt.s32.totalorder %s2071_s29, %s2067_s28 }
 0x358   :  { %p2074_p5 = por %p2073_p4, %p2072_p3 }
 0x35a   :  { %p2075_p6 = pnand %p2074_p5, %p2068_p2 }
 0x35c   :  { %2078 = shalt.err (!%p2075_p6)
}
 0x35d   :  { %s2079_s5 = scalar_lea.hbm %s3605_s2, 16 }
 0x35e   :  { %p2080_p7 = scmp.ne.s32.totalorder %s3605_s2, %s2079_s5  ;;  %p2083_p8 = scmp.lt.u32.totalorder %s2079_s5, %s3605_s2 }
 0x360   :  { %p2085_p9 = pnand %p2083_p8, %p2080_p7 }
 0x362   :  { %2088 = shalt.err (!%p2085_p9)
}
 0x363   :  { %1967 = dma.vmem_to_hbm [thread:$0]  %s3527_s6, 16, %s3605_s2, [#allocation7]  }
 0x364   :  { %s2089_s13 = scalar_lea.vmem %s3529_s11, 16  ;;  %s2093_s15 = scalar_lea.vmem %s3529_s11, 32 }
 0x365   :  { %p2090_p10 = scmp.ne.s32.totalorder %s3529_s11, %s2089_s13  ;;  %p2094_p11 = scmp.lt.s32.totalorder %s3529_s11, %s3529_s11 }
 0x366   :  { %p2095_p12 = scmp.lt.s32.totalorder %s2093_s15, %s2089_s13 }
 0x368   :  { %p2096_p13 = por %p2095_p12, %p2094_p11 }
 0x36a   :  { %p2097_p0 = pnand %p2096_p13, %p2090_p10 }
 0x36c   :  { %2100 = shalt.err (!%p2097_p0)
}
 0x36d   :  { %s2101_s18 = scalar_lea.hbm %s3606_s3, 16 }
 0x36e   :  { %p2102_p1 = scmp.ne.s32.totalorder %s3606_s3, %s2101_s18  ;;  %p2105_p2 = scmp.lt.u32.totalorder %s2101_s18, %s3606_s3 }
 0x370   :  { %p2107_p3 = pnand %p2105_p2, %p2102_p1 }
 0x372   :  { %2110 = shalt.err (!%p2107_p3)
}
 0x373   :  { %1977 = dma.vmem_to_hbm [thread:$0]  %s3529_s11, 16, %s3606_s3, [#allocation7]   ;;  %1947 = vst.msk [vmem:[#allocation9] sm:$0x1] %vm40_vm6, %v1946_v11 }
 0x374   :  { %s2111_s23 = scalar_lea.vmem %s3532_s14, 16  ;;  %s2115_s24 = scalar_lea.vmem %s3532_s14, 32 }
 0x375   :  { %p2112_p4 = scmp.ne.s32.totalorder %s3532_s14, %s2111_s23  ;;  %p2116_p5 = scmp.lt.s32.totalorder %s3532_s14, %s3532_s14 }
 0x376   :  { %p2117_p6 = scmp.lt.s32.totalorder %s2115_s24, %s2111_s23 }
 0x378   :  { %p2118_p7 = por %p2117_p6, %p2116_p5 }
 0x37a   :  { %p2119_p8 = pnand %p2118_p7, %p2112_p4 }
 0x37c   :  { %2122 = shalt.err (!%p2119_p8)
}
 0x37d   :  { %s2123_s27 = scalar_lea.hbm %s3607_s4, 16 }
 0x37e   :  { %p2124_p9 = scmp.ne.s32.totalorder %s3607_s4, %s2123_s27  ;;  %p2127_p10 = scmp.lt.u32.totalorder %s2123_s27, %s3607_s4 }
 0x380   :  { %p2129_p11 = pnand %p2127_p10, %p2124_p9 }
 0x382   :  { %2132 = shalt.err (!%p2129_p11)
}
 0x383   :  { %1987 = dma.vmem_to_hbm [thread:$0]  %s3532_s14, 16, %s3607_s4, [#allocation10]  }
 0x384   :  { %2135 = dma.done.wait [#allocation4], 16  }
 0x385   :  { %2136 = vsyncadd [#allocation4], 4294967280 }
 0x386   :  { %2137 = dma.done.wait [#allocation7], 32  }
 0x387   :  { %2138 = vsyncadd [#allocation7], 4294967264 }
 0x388   :  { %2139 = dma.done.wait [#allocation10], 16  }
 0x389   :  { %2140 = vsyncadd [#allocation10], 4294967280 }
 0x38a   :  { %2000 = vsyncpa [#allocation3], 1 }
 0x38b   :  { %2001 = vsyncpa [#allocation4], 1 }
 0x38c   :  { %2002 = vsyncpa [#allocation7], 1 }
 0x38d   :  { %2003 = vsyncpa [#allocation10], 1 }

</bundles_post_ra>
